<compile_context>
chip_gen: v7x
topology: tpu7x:2x2x1
jax: 0.10.0
libtpu: 0.0.40
codegen_flags: <defaults>
</compile_context>

<pallas_src>
import functools
import math

import jax
import jax.numpy as jnp
from jax.experimental import pallas as pl
from jax.experimental.pallas import tpu as pltpu

BN_EPS = 1e-5


# ----------------------------- Pallas kernels ------------------------------ #

def _conv3x3_kernel(x_ref, w_ref, y_ref, s_ref, q_ref, *, th, wimg):
    """3x3 conv on one halo'd row tile + per-tile channel statistics.

    x_ref: (1, 1, (th+2)*W, 3*Cin) bf16   padded rows, dx taps folded into lanes
    w_ref: (3, 3*Cin, tco)         bf16   weights, dy-major
    y_ref: (1, 1, th*W, tco)       f32    conv output tile
    s_ref: (1, 1, 1, tco)          f32    per-tile channel sum
    q_ref: (1, 1, 1, tco)          f32    per-tile channel sum of squares
    """
    m = th * wimg
    # dy = 0
    acc = jnp.dot(x_ref[0, 0, pl.ds(0, m), :], w_ref[0],
                  preferred_element_type=jnp.float32)
    for dy in (1, 2):  # static unroll over the vertical taps
        acc = acc + jnp.dot(x_ref[0, 0, pl.ds(dy * wimg, m), :], w_ref[dy],
                            preferred_element_type=jnp.float32)
    y_ref[0, 0] = acc
    s_ref[0, 0] = jnp.sum(acc, axis=0, keepdims=True)
    q_ref[0, 0] = jnp.sum(acc * acc, axis=0, keepdims=True)


def _bn_relu_kernel(x_ref, scale_ref, shift_ref, o_ref):
    """o = relu(x * scale + shift); all operands lane-dense (last dim % 128 == 0)."""
    o_ref[...] = jnp.maximum(
        x_ref[...] * scale_ref[...] + shift_ref[...], 0.0).astype(o_ref.dtype)


# ------------------------------ pallas_call wrappers ------------------------ #

def conv3x3_with_stats(x_tiles, w3, cout, *, th, wimg):
    """x_tiles: (N, nH, (th+2)*W, 3*Cin) bf16, w3: (3, 3*Cin, Cout) bf16."""
    n, nh, rows_in, c3 = x_tiles.shape
    m = th * wimg
    tco = cout if cout <= 128 else math.gcd(cout, 128)   # lane-dense for real U-Net sizes
    nco = cout // tco

    flops = 2 * n * nh * m * c3 * cout * 3
    bytes_accessed = (x_tiles.size * 2 * nco          # bf16 input tiles (refetched per Cout tile)
                      + w3.size * 2 * n * nh          # bf16 weights
                      + n * nh * m * cout * 4         # f32 conv output
                      + 2 * n * nh * cout * 4)        # f32 partial stats

    return pl.pallas_call(
        functools.partial(_conv3x3_kernel, th=th, wimg=wimg),
        out_shape=(
            jax.ShapeDtypeStruct((n, nh, m, cout), jnp.float32),
            jax.ShapeDtypeStruct((n, nh, 1, cout), jnp.float32),
            jax.ShapeDtypeStruct((n, nh, 1, cout), jnp.float32),
        ),
        grid_spec=pltpu.PrefetchScalarGridSpec(
            num_scalar_prefetch=0,
            grid=(n, nh, nco),
            in_specs=[
                pl.BlockSpec((1, 1, rows_in, c3), lambda i, j, k: (i, j, 0, 0)),
                pl.BlockSpec((3, c3, tco), lambda i, j, k: (0, 0, k)),
            ],
            out_specs=[
                pl.BlockSpec((1, 1, m, tco), lambda i, j, k: (i, j, 0, k)),
                pl.BlockSpec((1, 1, 1, tco), lambda i, j, k: (i, j, 0, k)),
                pl.BlockSpec((1, 1, 1, tco), lambda i, j, k: (i, j, 0, k)),
            ],
        ),
        compiler_params=pltpu.CompilerParams(
            # no cross-step accumulation -> all axes parallel (v7x megacore OK)
            dimension_semantics=("parallel", "parallel", "parallel"),
            vmem_limit_bytes=48 * 1024 * 1024,
        ),
        cost_estimate=pl.CostEstimate(
            flops=flops, transcendentals=0, bytes_accessed=bytes_accessed),
    )(x_tiles, w3)


def bn_relu_lane_dense(y, scale, shift, out_dtype):
    """y: (..., C) f32, scale/shift: (C,) f32 -> flat (R, L) activation, L % 128 == 0."""
    c = y.shape[-1]
    total = y.size
    l = (c * 128) // math.gcd(c, 128)   # lcm(C, 128)
    if total % l != 0:                  # fallback: keep C on lanes
        l = c
    reps = l // c
    r = total // l
    tr = math.gcd(r, 1024)              # row tile (divides R)
    if tr % 8 != 0:
        tr = r

    y2 = y.reshape(r, l)
    scale_t = jnp.tile(scale, reps).reshape(1, l)   # broadcast hoisted out of kernel
    shift_t = jnp.tile(shift, reps).reshape(1, l)

    return pl.pallas_call(
        _bn_relu_kernel,
        out_shape=jax.ShapeDtypeStruct((r, l), out_dtype),
        grid_spec=pltpu.PrefetchScalarGridSpec(
            num_scalar_prefetch=0,
            grid=(r // tr,),
            in_specs=[
                pl.BlockSpec((tr, l), lambda i: (i, 0)),
                pl.BlockSpec((1, l), lambda i: (0, 0)),
                pl.BlockSpec((1, l), lambda i: (0, 0)),
            ],
            out_specs=pl.BlockSpec((tr, l), lambda i: (i, 0)),
        ),
        compiler_params=pltpu.CompilerParams(
            dimension_semantics=("parallel",)),
    )(y2, scale_t, shift_t)


# ------------------------------ forward pass -------------------------------- #

def _conv_bn_relu_block(x_nhwc, w_hwio, gamma, beta, *, row_tile, out_dtype):
    n, h, wimg, cin = x_nhwc.shape
    cout = w_hwio.shape[-1]
    th = row_tile if (row_tile is not None and h % row_tile == 0) else h
    nh = h // th

    # Glue (pure JAX, fused by XLA): pad, fold the 3 dx taps into the channel
    # (lane) dim, build halo'd row tiles, flatten rows, cast operands to bf16.
    xp = jnp.pad(x_nhwc, ((0, 0), (1, 1), (1, 1), (0, 0)))               # (N,H+2,W+2,C)
    x3 = jnp.concatenate([xp[:, :, dx:dx + wimg, :] for dx in range(3)],
                         axis=-1)                                        # (N,H+2,W,3C)
    tiles = jnp.stack([x3[:, j * th:j * th + th + 2] for j in range(nh)],
                      axis=1)                                            # (N,nH,th+2,W,3C)
    x_tiles = tiles.reshape(n, nh, (th + 2) * wimg, 3 * cin).astype(jnp.bfloat16)
    w3 = w_hwio.reshape(3, 3 * cin, cout).astype(jnp.bfloat16)           # (3,3C,Cout)

    y, s, q = conv3x3_with_stats(x_tiles, w3, cout, th=th, wimg=wimg)

    # BatchNorm (training-mode batch statistics), computed in f32 from the
    # per-tile partial sums.
    cnt = n * h * wimg
    ssum = jnp.sum(s, axis=(0, 1, 2))
    sqs = jnp.sum(q, axis=(0, 1, 2))
    mean = ssum / cnt
    var = sqs / cnt - mean * mean          # biased var (BN training mode)
    scale = gamma * jax.lax.rsqrt(var + BN_EPS)
    shift = beta - mean * scale

    a = bn_relu_lane_dense(y, scale, shift, out_dtype)
    return a.reshape(n, h, wimg, cout)


def double_conv_forward(x_nchw, params, *, row_tile=8):
    w1, g1, b1, w2, g2, b2 = params        # w*: (3, 3, Cin, Cout) HWIO, f32
    x = jnp.transpose(x_nchw, (0, 2, 3, 1))                       # NCHW -> NHWC
    a1 = _conv_bn_relu_block(x, w1, g1, b1, row_tile=row_tile,
                             out_dtype=jnp.bfloat16)              # feeds next conv (bf16 operands)
    a2 = _conv_bn_relu_block(a1, w2, g2, b2, row_tile=row_tile,
                             out_dtype=jnp.float32)
    return jnp.transpose(a2, (0, 3, 1, 2))                        # NHWC -> NCHW


# ------------------------------ params & reference -------------------------- #

def init_params(key, in_channels, out_channels):
    # torch.nn.init.normal_(weight, mean=0.0, std=sqrt(2 / 9 * in_channels))
    # (both convs use the class attribute in_channels, matching the module)
    std = math.sqrt(2.0 / 9.0 * in_channels)
    k1, k2 = jax.random.split(key)
    w1 = jax.random.normal(k1, (out_channels, in_channels, 3, 3), jnp.float32) * std
    w2 = jax.random.normal(k2, (out_channels, out_channels, 3, 3), jnp.float32) * std
    w1 = jnp.transpose(w1, (2, 3, 1, 0))  # OIHW -> HWIO
    w2 = jnp.transpose(w2, (2, 3, 1, 0))
    g1 = jnp.ones((out_channels,), jnp.float32)
    b1 = jnp.zeros((out_channels,), jnp.float32)
    g2 = jnp.ones((out_channels,), jnp.float32)
    b2 = jnp.zeros((out_channels,), jnp.float32)
    return (w1, g1, b1, w2, g2, b2)


def reference_forward(x_nchw, params):
    w1, g1, b1, w2, g2, b2 = params
    x = jnp.transpose(x_nchw, (0, 2, 3, 1))

    def block(x_nhwc, wk, gamma, beta):
        y = jax.lax.conv_general_dilated(
            x_nhwc, wk, window_strides=(1, 1), padding=((1, 1), (1, 1)),
            dimension_numbers=("NHWC", "HWIO", "NHWC"),
            precision=jax.lax.Precision.HIGHEST)
        mean = jnp.mean(y, axis=(0, 1, 2))
        var = jnp.mean((y - mean) ** 2, axis=(0, 1, 2))
        yh = (y - mean) * jax.lax.rsqrt(var + BN_EPS)
        return jnp.maximum(yh * gamma + beta, 0.0)

    a1 = block(x, w1, g1, b1)
    a2 = block(a1, w2, g2, b2)
    return jnp.transpose(a2, (0, 3, 1, 2))


# ------------------------------------ main ---------------------------------- #

if __name__ == "__main__":
    N, CIN, COUT, H, W = 2, 4, 16, 16, 16
    key = jax.random.PRNGKey(0)
    kx, kp = jax.random.split(key)
    x = jax.random.normal(kx, (N, CIN, H, W), jnp.float32)
    params = init_params(kp, CIN, COUT)

    fwd = jax.jit(functools.partial(double_conv_forward, row_tile=8))
    out = jax.block_until_ready(fwd(x, params))

    assert out.shape == (N, COUT, H, W), out.shape
    ref = reference_forward(x, params)
    max_err = float(jnp.max(jnp.abs(out - ref)))
    # bf16 matmul operands with f32 accumulation vs. f32 HIGHEST reference.
    if not jnp.allclose(out, ref, atol=2e-2, rtol=2e-2):
        raise ValueError(
            f"Pallas DoubleConv does not match reference (max abs err {max_err})")
    print("KERNEL_OK")
</pallas_src>

<mosaic_0001>
module attributes {stable_mosaic.version = 11 : i64} {
  func.func @_conv3x3_kernel(%arg0: i32, %arg1: i32, %arg2: i32, %arg3: memref<1x1x160x12xbf16, #tpu.memory_space<vmem>>, %arg4: memref<3x12x16xbf16, #tpu.memory_space<vmem>>, %arg5: memref<1x1x128x16xf32, #tpu.memory_space<vmem>>, %arg6: memref<1x1x1x16xf32, #tpu.memory_space<vmem>>, %arg7: memref<1x1x1x16xf32, #tpu.memory_space<vmem>>) attributes {dimension_semantics = [#tpu.dimension_semantics<parallel>, #tpu.dimension_semantics<parallel>, #tpu.dimension_semantics<parallel>], iteration_bounds = array<i64: 2, 2, 1>, scalar_prefetch = 0 : i64, scratch_operands = 0 : i64, tpu.core_type = #tpu.core_type<tc>, window_params = [{transform_indices = @transform_0, window_bounds = array<i64: 1, 1, 160, 12>}, {transform_indices = @transform_1, window_bounds = array<i64: 3, 12, 16>}, {transform_indices = @transform_2, window_bounds = array<i64: 1, 1, 128, 16>}, {transform_indices = @transform_3, window_bounds = array<i64: 1, 1, 1, 16>}, {transform_indices = @transform_4, window_bounds = array<i64: 1, 1, 1, 16>}]} {
    %c0 = arith.constant 0 : index
    %c0_0 = arith.constant 0 : index
    %c0_1 = arith.constant 0 : index
    %c0_2 = arith.constant 0 : index
    %0 = vector.load %arg3[%c0, %c0_0, %c0_1, %c0_2] : memref<1x1x160x12xbf16, #tpu.memory_space<vmem>>, vector<1x1x128x12xbf16>
    %1 = vector.shape_cast %0 : vector<1x1x128x12xbf16> to vector<128x12xbf16>
    %c0_3 = arith.constant 0 : index
    %c0_4 = arith.constant 0 : index
    %c0_5 = arith.constant 0 : index
    %2 = vector.load %arg4[%c0_3, %c0_4, %c0_5] : memref<3x12x16xbf16, #tpu.memory_space<vmem>>, vector<1x12x16xbf16>
    %3 = vector.shape_cast %2 : vector<1x12x16xbf16> to vector<12x16xbf16>
    %cst = arith.constant dense<0.000000e+00> : vector<128x16xf32>
    %4 = tpu.matmul %1, %3, %cst {dimension_numbers = #tpu.dot_dimension_numbers<[1], [0], [0], [1], [0, 0, 1, 1], [], []>} : vector<128x12xbf16>, vector<12x16xbf16>, vector<128x16xf32> -> vector<128x16xf32>
    %c0_6 = arith.constant 0 : index
    %c0_7 = arith.constant 0 : index
    %c16 = arith.constant 16 : index
    %c0_8 = arith.constant 0 : index
    %5 = vector.load %arg3[%c0_6, %c0_7, %c16, %c0_8] : memref<1x1x160x12xbf16, #tpu.memory_space<vmem>>, vector<1x1x128x12xbf16>
    %6 = vector.shape_cast %5 : vector<1x1x128x12xbf16> to vector<128x12xbf16>
    %c1 = arith.constant 1 : index
    %c0_9 = arith.constant 0 : index
    %c0_10 = arith.constant 0 : index
    %7 = vector.load %arg4[%c1, %c0_9, %c0_10] : memref<3x12x16xbf16, #tpu.memory_space<vmem>>, vector<1x12x16xbf16>
    %8 = vector.shape_cast %7 : vector<1x12x16xbf16> to vector<12x16xbf16>
    %cst_11 = arith.constant dense<0.000000e+00> : vector<128x16xf32>
    %9 = tpu.matmul %6, %8, %cst_11 {dimension_numbers = #tpu.dot_dimension_numbers<[1], [0], [0], [1], [0, 0, 1, 1], [], []>} : vector<128x12xbf16>, vector<12x16xbf16>, vector<128x16xf32> -> vector<128x16xf32>
    %10 = arith.addf %4, %9 : vector<128x16xf32>
    %c0_12 = arith.constant 0 : index
    %c0_13 = arith.constant 0 : index
    %c32 = arith.constant 32 : index
    %c0_14 = arith.constant 0 : index
    %11 = vector.load %arg3[%c0_12, %c0_13, %c32, %c0_14] : memref<1x1x160x12xbf16, #tpu.memory_space<vmem>>, vector<1x1x128x12xbf16>
    %12 = vector.shape_cast %11 : vector<1x1x128x12xbf16> to vector<128x12xbf16>
    %c2 = arith.constant 2 : index
    %c0_15 = arith.constant 0 : index
    %c0_16 = arith.constant 0 : index
    %13 = vector.load %arg4[%c2, %c0_15, %c0_16] : memref<3x12x16xbf16, #tpu.memory_space<vmem>>, vector<1x12x16xbf16>
    %14 = vector.shape_cast %13 : vector<1x12x16xbf16> to vector<12x16xbf16>
    %cst_17 = arith.constant dense<0.000000e+00> : vector<128x16xf32>
    %15 = tpu.matmul %12, %14, %cst_17 {dimension_numbers = #tpu.dot_dimension_numbers<[1], [0], [0], [1], [0, 0, 1, 1], [], []>} : vector<128x12xbf16>, vector<12x16xbf16>, vector<128x16xf32> -> vector<128x16xf32>
    %16 = arith.addf %10, %15 : vector<128x16xf32>
    %c0_18 = arith.constant 0 : index
    %c0_19 = arith.constant 0 : index
    %c0_20 = arith.constant 0 : index
    %c0_21 = arith.constant 0 : index
    %17 = vector.load %arg5[%c0_18, %c0_19, %c0_20, %c0_21] : memref<1x1x128x16xf32, #tpu.memory_space<vmem>>, vector<1x1x128x16xf32>
    %18 = vector.shape_cast %17 : vector<1x1x128x16xf32> to vector<128x16xf32>
    %19 = vector.shape_cast %16 : vector<128x16xf32> to vector<1x1x128x16xf32>
    tpu.vector_store %arg5[%c0_18, %c0_19, %c0_20, %c0_21], %19 {strides = array<i32>} : memref<1x1x128x16xf32, #tpu.memory_space<vmem>>, vector<1x1x128x16xf32>,
    %cst_22 = arith.constant dense<0.000000e+00> : vector<16xf32>
    %20 = vector.multi_reduction <add>, %16, %cst_22 [0] : vector<128x16xf32> to vector<16xf32>
    %21 = vector.shape_cast %20 : vector<16xf32> to vector<1x16xf32>
    %c0_23 = arith.constant 0 : index
    %c0_24 = arith.constant 0 : index
    %c0_25 = arith.constant 0 : index
    %c0_26 = arith.constant 0 : index
    %22 = vector.load %arg6[%c0_23, %c0_24, %c0_25, %c0_26] : memref<1x1x1x16xf32, #tpu.memory_space<vmem>>, vector<1x1x1x16xf32>
    %23 = vector.shape_cast %22 : vector<1x1x1x16xf32> to vector<1x16xf32>
    %24 = vector.shape_cast %21 : vector<1x16xf32> to vector<1x1x1x16xf32>
    tpu.vector_store %arg6[%c0_23, %c0_24, %c0_25, %c0_26], %24 {strides = array<i32>} : memref<1x1x1x16xf32, #tpu.memory_space<vmem>>, vector<1x1x1x16xf32>,
    %25 = arith.mulf %16, %16 : vector<128x16xf32>
    %cst_27 = arith.constant dense<0.000000e+00> : vector<16xf32>
    %26 = vector.multi_reduction <add>, %25, %cst_27 [0] : vector<128x16xf32> to vector<16xf32>
    %27 = vector.shape_cast %26 : vector<16xf32> to vector<1x16xf32>
    %c0_28 = arith.constant 0 : index
    %c0_29 = arith.constant 0 : index
    %c0_30 = arith.constant 0 : index
    %c0_31 = arith.constant 0 : index
    %28 = vector.load %arg7[%c0_28, %c0_29, %c0_30, %c0_31] : memref<1x1x1x16xf32, #tpu.memory_space<vmem>>, vector<1x1x1x16xf32>
    %29 = vector.shape_cast %28 : vector<1x1x1x16xf32> to vector<1x16xf32>
    %30 = vector.shape_cast %27 : vector<1x16xf32> to vector<1x1x1x16xf32>
    tpu.vector_store %arg7[%c0_28, %c0_29, %c0_30, %c0_31], %30 {strides = array<i32>} : memref<1x1x1x16xf32, #tpu.memory_space<vmem>>, vector<1x1x1x16xf32>,
    return
  }
  func.func @transform_0(%arg0: i32, %arg1: i32, %arg2: i32) -> (i32, i32, i32, i32) {
    %c0_i32 = arith.constant 0 : i32
    %c0_i32_0 = arith.constant 0 : i32
    %c0_i32_1 = arith.constant 0 : i32
    return %arg0, %arg1, %c0_i32, %c0_i32_0 : i32, i32, i32, i32
  }
  func.func @transform_1(%arg0: i32, %arg1: i32, %arg2: i32) -> (i32, i32, i32) {
    %c0_i32 = arith.constant 0 : i32
    %c0_i32_0 = arith.constant 0 : i32
    %c0_i32_1 = arith.constant 0 : i32
    return %c0_i32, %c0_i32_0, %arg2 : i32, i32, i32
  }
  func.func @transform_2(%arg0: i32, %arg1: i32, %arg2: i32) -> (i32, i32, i32, i32) {
    %c0_i32 = arith.constant 0 : i32
    %c0_i32_0 = arith.constant 0 : i32
    return %arg0, %arg1, %c0_i32, %arg2 : i32, i32, i32, i32
  }
  func.func @transform_3(%arg0: i32, %arg1: i32, %arg2: i32) -> (i32, i32, i32, i32) {
    %c0_i32 = arith.constant 0 : i32
    %c0_i32_0 = arith.constant 0 : i32
    return %arg0, %arg1, %c0_i32, %arg2 : i32, i32, i32, i32
  }
  func.func @transform_4(%arg0: i32, %arg1: i32, %arg2: i32) -> (i32, i32, i32, i32) {
    %c0_i32 = arith.constant 0 : i32
    %c0_i32_0 = arith.constant 0 : i32
    return %arg0, %arg1, %c0_i32, %arg2 : i32, i32, i32, i32
  }
}

module attributes {stable_mosaic.version = 11 : i64} {
  func.func @_bn_relu_kernel(%arg0: i32, %arg1: memref<64x128xf32, #tpu.memory_space<vmem>>, %arg2: memref<1x128xf32, #tpu.memory_space<vmem>>, %arg3: memref<1x128xf32, #tpu.memory_space<vmem>>, %arg4: memref<64x128xbf16, #tpu.memory_space<vmem>>) attributes {dimension_semantics = [#tpu.dimension_semantics<parallel>], iteration_bounds = array<i64: 1>, scalar_prefetch = 0 : i64, scratch_operands = 0 : i64, tpu.core_type = #tpu.core_type<tc>, window_params = [{transform_indices = @transform_0, window_bounds = array<i64: 64, 128>}, {pipeline_mode = #tpu.pipeline_mode<synchronous>, transform_indices = @transform_1, window_bounds = array<i64: 1, 128>}, {pipeline_mode = #tpu.pipeline_mode<synchronous>, transform_indices = @transform_2, window_bounds = array<i64: 1, 128>}, {transform_indices = @transform_3, window_bounds = array<i64: 64, 128>}]} {
    %c0 = arith.constant 0 : index
    %c0_0 = arith.constant 0 : index
    %0 = vector.load %arg1[%c0, %c0_0] : memref<64x128xf32, #tpu.memory_space<vmem>>, vector<64x128xf32>
    %c0_1 = arith.constant 0 : index
    %c0_2 = arith.constant 0 : index
    %1 = vector.load %arg2[%c0_1, %c0_2] : memref<1x128xf32, #tpu.memory_space<vmem>>, vector<1x128xf32>
    %2 = vector.broadcast %1 : vector<1x128xf32> to vector<64x128xf32>
    %3 = arith.mulf %0, %2 : vector<64x128xf32>
    %c0_3 = arith.constant 0 : index
    %c0_4 = arith.constant 0 : index
    %4 = vector.load %arg3[%c0_3, %c0_4] : memref<1x128xf32, #tpu.memory_space<vmem>>, vector<1x128xf32>
    %5 = vector.broadcast %4 : vector<1x128xf32> to vector<64x128xf32>
    %6 = arith.addf %3, %5 : vector<64x128xf32>
    %cst = arith.constant 0.000000e+00 : f32
    %7 = vector.broadcast %cst : f32 to vector<64x128xf32>
    %8 = arith.maximumf %6, %7 : vector<64x128xf32>
    %9 = arith.truncf %8 : vector<64x128xf32> to vector<64x128xbf16>
    %c0_5 = arith.constant 0 : index
    %c0_6 = arith.constant 0 : index
    %10 = vector.load %arg4[%c0_5, %c0_6] : memref<64x128xbf16, #tpu.memory_space<vmem>>, vector<64x128xbf16>
    tpu.vector_store %arg4[%c0_5, %c0_6], %9 {strides = array<i32>} : memref<64x128xbf16, #tpu.memory_space<vmem>>, vector<64x128xbf16>,
    return
  }
  func.func @transform_0(%arg0: i32) -> (i32, i32) {
    %c0_i32 = arith.constant 0 : i32
    %c0_i32_0 = arith.constant 0 : i32
    return %arg0, %c0_i32 : i32, i32
  }
  func.func @transform_1(%arg0: i32) -> (i32, i32) {
    %c0_i32 = arith.constant 0 : i32
    %c0_i32_0 = arith.constant 0 : i32
    %c0_i32_1 = arith.constant 0 : i32
    return %c0_i32, %c0_i32_0 : i32, i32
  }
  func.func @transform_2(%arg0: i32) -> (i32, i32) {
    %c0_i32 = arith.constant 0 : i32
    %c0_i32_0 = arith.constant 0 : i32
    %c0_i32_1 = arith.constant 0 : i32
    return %c0_i32, %c0_i32_0 : i32, i32
  }
  func.func @transform_3(%arg0: i32) -> (i32, i32) {
    %c0_i32 = arith.constant 0 : i32
    %c0_i32_0 = arith.constant 0 : i32
    return %arg0, %c0_i32 : i32, i32
  }
}

module attributes {stable_mosaic.version = 11 : i64} {
  func.func @_conv3x3_kernel(%arg0: i32, %arg1: i32, %arg2: i32, %arg3: memref<1x1x160x48xbf16, #tpu.memory_space<vmem>>, %arg4: memref<3x48x16xbf16, #tpu.memory_space<vmem>>, %arg5: memref<1x1x128x16xf32, #tpu.memory_space<vmem>>, %arg6: memref<1x1x1x16xf32, #tpu.memory_space<vmem>>, %arg7: memref<1x1x1x16xf32, #tpu.memory_space<vmem>>) attributes {dimension_semantics = [#tpu.dimension_semantics<parallel>, #tpu.dimension_semantics<parallel>, #tpu.dimension_semantics<parallel>], iteration_bounds = array<i64: 2, 2, 1>, scalar_prefetch = 0 : i64, scratch_operands = 0 : i64, tpu.core_type = #tpu.core_type<tc>, window_params = [{transform_indices = @transform_0, window_bounds = array<i64: 1, 1, 160, 48>}, {transform_indices = @transform_1, window_bounds = array<i64: 3, 48, 16>}, {transform_indices = @transform_2, window_bounds = array<i64: 1, 1, 128, 16>}, {transform_indices = @transform_3, window_bounds = array<i64: 1, 1, 1, 16>}, {transform_indices = @transform_4, window_bounds = array<i64: 1, 1, 1, 16>}]} {
    %c0 = arith.constant 0 : index
    %c0_0 = arith.constant 0 : index
    %c0_1 = arith.constant 0 : index
    %c0_2 = arith.constant 0 : index
    %0 = vector.load %arg3[%c0, %c0_0, %c0_1, %c0_2] : memref<1x1x160x48xbf16, #tpu.memory_space<vmem>>, vector<1x1x128x48xbf16>
    %1 = vector.shape_cast %0 : vector<1x1x128x48xbf16> to vector<128x48xbf16>
    %c0_3 = arith.constant 0 : index
    %c0_4 = arith.constant 0 : index
    %c0_5 = arith.constant 0 : index
    %2 = vector.load %arg4[%c0_3, %c0_4, %c0_5] : memref<3x48x16xbf16, #tpu.memory_space<vmem>>, vector<1x48x16xbf16>
    %3 = vector.shape_cast %2 : vector<1x48x16xbf16> to vector<48x16xbf16>
    %cst = arith.constant dense<0.000000e+00> : vector<128x16xf32>
    %4 = tpu.matmul %1, %3, %cst {dimension_numbers = #tpu.dot_dimension_numbers<[1], [0], [0], [1], [0, 0, 1, 1], [], []>} : vector<128x48xbf16>, vector<48x16xbf16>, vector<128x16xf32> -> vector<128x16xf32>
    %c0_6 = arith.constant 0 : index
    %c0_7 = arith.constant 0 : index
    %c16 = arith.constant 16 : index
    %c0_8 = arith.constant 0 : index
    %5 = vector.load %arg3[%c0_6, %c0_7, %c16, %c0_8] : memref<1x1x160x48xbf16, #tpu.memory_space<vmem>>, vector<1x1x128x48xbf16>
    %6 = vector.shape_cast %5 : vector<1x1x128x48xbf16> to vector<128x48xbf16>
    %c1 = arith.constant 1 : index
    %c0_9 = arith.constant 0 : index
    %c0_10 = arith.constant 0 : index
    %7 = vector.load %arg4[%c1, %c0_9, %c0_10] : memref<3x48x16xbf16, #tpu.memory_space<vmem>>, vector<1x48x16xbf16>
    %8 = vector.shape_cast %7 : vector<1x48x16xbf16> to vector<48x16xbf16>
    %cst_11 = arith.constant dense<0.000000e+00> : vector<128x16xf32>
    %9 = tpu.matmul %6, %8, %cst_11 {dimension_numbers = #tpu.dot_dimension_numbers<[1], [0], [0], [1], [0, 0, 1, 1], [], []>} : vector<128x48xbf16>, vector<48x16xbf16>, vector<128x16xf32> -> vector<128x16xf32>
    %10 = arith.addf %4, %9 : vector<128x16xf32>
    %c0_12 = arith.constant 0 : index
    %c0_13 = arith.constant 0 : index
    %c32 = arith.constant 32 : index
    %c0_14 = arith.constant 0 : index
    %11 = vector.load %arg3[%c0_12, %c0_13, %c32, %c0_14] : memref<1x1x160x48xbf16, #tpu.memory_space<vmem>>, vector<1x1x128x48xbf16>
    %12 = vector.shape_cast %11 : vector<1x1x128x48xbf16> to vector<128x48xbf16>
    %c2 = arith.constant 2 : index
    %c0_15 = arith.constant 0 : index
    %c0_16 = arith.constant 0 : index
    %13 = vector.load %arg4[%c2, %c0_15, %c0_16] : memref<3x48x16xbf16, #tpu.memory_space<vmem>>, vector<1x48x16xbf16>
    %14 = vector.shape_cast %13 : vector<1x48x16xbf16> to vector<48x16xbf16>
    %cst_17 = arith.constant dense<0.000000e+00> : vector<128x16xf32>
    %15 = tpu.matmul %12, %14, %cst_17 {dimension_numbers = #tpu.dot_dimension_numbers<[1], [0], [0], [1], [0, 0, 1, 1], [], []>} : vector<128x48xbf16>, vector<48x16xbf16>, vector<128x16xf32> -> vector<128x16xf32>
    %16 = arith.addf %10, %15 : vector<128x16xf32>
    %c0_18 = arith.constant 0 : index
    %c0_19 = arith.constant 0 : index
    %c0_20 = arith.constant 0 : index
    %c0_21 = arith.constant 0 : index
    %17 = vector.load %arg5[%c0_18, %c0_19, %c0_20, %c0_21] : memref<1x1x128x16xf32, #tpu.memory_space<vmem>>, vector<1x1x128x16xf32>
    %18 = vector.shape_cast %17 : vector<1x1x128x16xf32> to vector<128x16xf32>
    %19 = vector.shape_cast %16 : vector<128x16xf32> to vector<1x1x128x16xf32>
    tpu.vector_store %arg5[%c0_18, %c0_19, %c0_20, %c0_21], %19 {strides = array<i32>} : memref<1x1x128x16xf32, #tpu.memory_space<vmem>>, vector<1x1x128x16xf32>,
    %cst_22 = arith.constant dense<0.000000e+00> : vector<16xf32>
    %20 = vector.multi_reduction <add>, %16, %cst_22 [0] : vector<128x16xf32> to vector<16xf32>
    %21 = vector.shape_cast %20 : vector<16xf32> to vector<1x16xf32>
    %c0_23 = arith.constant 0 : index
    %c0_24 = arith.constant 0 : index
    %c0_25 = arith.constant 0 : index
    %c0_26 = arith.constant 0 : index
    %22 = vector.load %arg6[%c0_23, %c0_24, %c0_25, %c0_26] : memref<1x1x1x16xf32, #tpu.memory_space<vmem>>, vector<1x1x1x16xf32>
    %23 = vector.shape_cast %22 : vector<1x1x1x16xf32> to vector<1x16xf32>
    %24 = vector.shape_cast %21 : vector<1x16xf32> to vector<1x1x1x16xf32>
    tpu.vector_store %arg6[%c0_23, %c0_24, %c0_25, %c0_26], %24 {strides = array<i32>} : memref<1x1x1x16xf32, #tpu.memory_space<vmem>>, vector<1x1x1x16xf32>,
    %25 = arith.mulf %16, %16 : vector<128x16xf32>
    %cst_27 = arith.constant dense<0.000000e+00> : vector<16xf32>
    %26 = vector.multi_reduction <add>, %25, %cst_27 [0] : vector<128x16xf32> to vector<16xf32>
    %27 = vector.shape_cast %26 : vector<16xf32> to vector<1x16xf32>
    %c0_28 = arith.constant 0 : index
    %c0_29 = arith.constant 0 : index
    %c0_30 = arith.constant 0 : index
    %c0_31 = arith.constant 0 : index
    %28 = vector.load %arg7[%c0_28, %c0_29, %c0_30, %c0_31] : memref<1x1x1x16xf32, #tpu.memory_space<vmem>>, vector<1x1x1x16xf32>
    %29 = vector.shape_cast %28 : vector<1x1x1x16xf32> to vector<1x16xf32>
    %30 = vector.shape_cast %27 : vector<1x16xf32> to vector<1x1x1x16xf32>
    tpu.vector_store %arg7[%c0_28, %c0_29, %c0_30, %c0_31], %30 {strides = array<i32>} : memref<1x1x1x16xf32, #tpu.memory_space<vmem>>, vector<1x1x1x16xf32>,
    return
  }
  func.func @transform_0(%arg0: i32, %arg1: i32, %arg2: i32) -> (i32, i32, i32, i32) {
    %c0_i32 = arith.constant 0 : i32
    %c0_i32_0 = arith.constant 0 : i32
    %c0_i32_1 = arith.constant 0 : i32
    return %arg0, %arg1, %c0_i32, %c0_i32_0 : i32, i32, i32, i32
  }
  func.func @transform_1(%arg0: i32, %arg1: i32, %arg2: i32) -> (i32, i32, i32) {
    %c0_i32 = arith.constant 0 : i32
    %c0_i32_0 = arith.constant 0 : i32
    %c0_i32_1 = arith.constant 0 : i32
    return %c0_i32, %c0_i32_0, %arg2 : i32, i32, i32
  }
  func.func @transform_2(%arg0: i32, %arg1: i32, %arg2: i32) -> (i32, i32, i32, i32) {
    %c0_i32 = arith.constant 0 : i32
    %c0_i32_0 = arith.constant 0 : i32
    return %arg0, %arg1, %c0_i32, %arg2 : i32, i32, i32, i32
  }
  func.func @transform_3(%arg0: i32, %arg1: i32, %arg2: i32) -> (i32, i32, i32, i32) {
    %c0_i32 = arith.constant 0 : i32
    %c0_i32_0 = arith.constant 0 : i32
    return %arg0, %arg1, %c0_i32, %arg2 : i32, i32, i32, i32
  }
  func.func @transform_4(%arg0: i32, %arg1: i32, %arg2: i32) -> (i32, i32, i32, i32) {
    %c0_i32 = arith.constant 0 : i32
    %c0_i32_0 = arith.constant 0 : i32
    return %arg0, %arg1, %c0_i32, %arg2 : i32, i32, i32, i32
  }
}

module attributes {stable_mosaic.version = 11 : i64} {
  func.func @_bn_relu_kernel(%arg0: i32, %arg1: memref<64x128xf32, #tpu.memory_space<vmem>>, %arg2: memref<1x128xf32, #tpu.memory_space<vmem>>, %arg3: memref<1x128xf32, #tpu.memory_space<vmem>>, %arg4: memref<64x128xf32, #tpu.memory_space<vmem>>) attributes {dimension_semantics = [#tpu.dimension_semantics<parallel>], iteration_bounds = array<i64: 1>, scalar_prefetch = 0 : i64, scratch_operands = 0 : i64, tpu.core_type = #tpu.core_type<tc>, window_params = [{transform_indices = @transform_0, window_bounds = array<i64: 64, 128>}, {pipeline_mode = #tpu.pipeline_mode<synchronous>, transform_indices = @transform_1, window_bounds = array<i64: 1, 128>}, {pipeline_mode = #tpu.pipeline_mode<synchronous>, transform_indices = @transform_2, window_bounds = array<i64: 1, 128>}, {transform_indices = @transform_3, window_bounds = array<i64: 64, 128>}]} {
    %c0 = arith.constant 0 : index
    %c0_0 = arith.constant 0 : index
    %0 = vector.load %arg1[%c0, %c0_0] : memref<64x128xf32, #tpu.memory_space<vmem>>, vector<64x128xf32>
    %c0_1 = arith.constant 0 : index
    %c0_2 = arith.constant 0 : index
    %1 = vector.load %arg2[%c0_1, %c0_2] : memref<1x128xf32, #tpu.memory_space<vmem>>, vector<1x128xf32>
    %2 = vector.broadcast %1 : vector<1x128xf32> to vector<64x128xf32>
    %3 = arith.mulf %0, %2 : vector<64x128xf32>
    %c0_3 = arith.constant 0 : index
    %c0_4 = arith.constant 0 : index
    %4 = vector.load %arg3[%c0_3, %c0_4] : memref<1x128xf32, #tpu.memory_space<vmem>>, vector<1x128xf32>
    %5 = vector.broadcast %4 : vector<1x128xf32> to vector<64x128xf32>
    %6 = arith.addf %3, %5 : vector<64x128xf32>
    %cst = arith.constant 0.000000e+00 : f32
    %7 = vector.broadcast %cst : f32 to vector<64x128xf32>
    %8 = arith.maximumf %6, %7 : vector<64x128xf32>
    %c0_5 = arith.constant 0 : index
    %c0_6 = arith.constant 0 : index
    %9 = vector.load %arg4[%c0_5, %c0_6] : memref<64x128xf32, #tpu.memory_space<vmem>>, vector<64x128xf32>
    tpu.vector_store %arg4[%c0_5, %c0_6], %8 {strides = array<i32>} : memref<64x128xf32, #tpu.memory_space<vmem>>, vector<64x128xf32>,
    return
  }
  func.func @transform_0(%arg0: i32) -> (i32, i32) {
    %c0_i32 = arith.constant 0 : i32
    %c0_i32_0 = arith.constant 0 : i32
    return %arg0, %c0_i32 : i32, i32
  }
  func.func @transform_1(%arg0: i32) -> (i32, i32) {
    %c0_i32 = arith.constant 0 : i32
    %c0_i32_0 = arith.constant 0 : i32
    %c0_i32_1 = arith.constant 0 : i32
    return %c0_i32, %c0_i32_0 : i32, i32
  }
  func.func @transform_2(%arg0: i32) -> (i32, i32) {
    %c0_i32 = arith.constant 0 : i32
    %c0_i32_0 = arith.constant 0 : i32
    %c0_i32_1 = arith.constant 0 : i32
    return %c0_i32, %c0_i32_0 : i32, i32
  }
  func.func @transform_3(%arg0: i32) -> (i32, i32) {
    %c0_i32 = arith.constant 0 : i32
    %c0_i32_0 = arith.constant 0 : i32
    return %arg0, %c0_i32 : i32, i32
  }
}

</mosaic_0001>

<bundles_post_ra>
// kernel: tile.23
= control target key start
LH: loop header
LB: loop body
LE: loop exit
PB: predicated region body
PF: predicated region fallthrough
CT: control target
= control target key end

     0   :  { %s22_s0 = inlined_call_operand.vmem [shape: f32[16], index: 0, kind: input, shape index: {}]   ;;  %s23_s1 = inlined_call_operand.vmem [shape: f32[8,16], index: 1, kind: output, shape index: {}]  }
   0x1   :  { %v4_v0 = vld [vmem:[%s22_s0] ss:$0 sm:$0xff] }
   0x2   :  { %5 = vst [vmem:[%s23_s1] sm:$0xff] %v4_v0 }

// kernel: tile.24
= control target key start
LH: loop header
LB: loop body
LE: loop exit
PB: predicated region body
PF: predicated region fallthrough
CT: control target
= control target key end

     0   :  { %s67_s10 = smov 112   ;;  %s68_s11 = smov 80   ;;  %vm3_vm0 = vcmask 130048   ;;  %vm9_vm1 = vcmask 1048448   ;;  %vm15_vm2 = vcmask 917248   ;;  %vm21_vm3 = vcmask 786048   ;;  %s111_s0 = inlined_call_operand.vmem [shape: f32[8,16], index: 0, kind: input, shape index: {}]   ;;  %s112_s1 = inlined_call_operand.vmem [shape: f32[1,128], index: 1, kind: output, shape index: {}]  }
   0x1   :  { %v53_v0 = vld [vmem:[%s111_s0 + $0x7] sm:$0x1]   ;;  %v55_v1 = vld [vmem:[%s111_s0 + $0x5] sm:$0x1]   ;;  %v54_v2 = vld [vmem:[%s111_s0 + $0x6] sm:$0x1]  }
   0x2   :  { %7 = vrot.lane.b32.xlu0 %v53_v0, %s67_s10  ;;  %19 = vrot.lane.b32.xlu1 %v55_v1, %s68_s11  ;;  %v56_v3 = vld [vmem:[%s111_s0 + $0x4] sm:$0x1]   ;;  %v2_v4 = vld [vmem:[%s111_s0] sm:$0x1]   ;;  %s69_s18 = smov 96   ;;  %s70_s19 = smov 64  }
   0x3   :  { %4 = vst.msk [vmem:[#allocation0] sm:$0x1] %vm3_vm0, %v2_v4   ;;  %v57_v5 = vld [vmem:[%s111_s0 + $0x3] sm:$0x1]   ;;  %v58_v6 = vld [vmem:[%s111_s0 + $0x2] sm:$0x1]  }
   0x4   :  { %s71_s24 = smov 48   ;;  %s72_s25 = smov 32   ;;  %v59_v7 = vld [vmem:[%s111_s0 + $0x1] sm:$0x1]   ;;  %vm27_vm4 = vcmask 654848   ;;  %vm33_vm5 = vcmask 523648  }
   0x5   :  { %s73_s0 = smov 16   ;;  %vm39_vm6 = vcmask 392448   ;;  %vm45_vm7 = vcmask 261248  }
   0x6   :  { %13 = vrot.lane.b32.xlu0 %v54_v2, %s69_s18  ;;  %25 = vrot.lane.b32.xlu1 %v56_v3, %s70_s19 }
   0xa   :  { %31 = vrot.lane.b32.xlu0 %v57_v5, %s71_s24  ;;  %37 = vrot.lane.b32.xlu1 %v58_v6, %s72_s25 }
   0xe   :  { %43 = vrot.lane.b32.xlu0 %v59_v7, %s73_s0 }
  0x74   :  { %v8_v8 = vpop.permute.xlu0 %7   ;;  %v20_v9 = vpop.permute.xlu1 %19  }
  0x75   :  { %10 = vst.msk [vmem:[#allocation0] sm:$0x1] %vm9_vm1, %v8_v8  }
  0x78   :  { %v14_v10 = vpop.permute.xlu0 %13   ;;  %v26_v11 = vpop.permute.xlu1 %25  }
  0x79   :  { %16 = vst.msk [vmem:[#allocation0] sm:$0x1] %vm15_vm2, %v14_v10  }
  0x7a   :  { %22 = vst.msk [vmem:[#allocation0] sm:$0x1] %vm21_vm3, %v20_v9  }
  0x7b   :  { %28 = vst.msk [vmem:[#allocation0] sm:$0x1] %vm27_vm4, %v26_v11  }
  0x7c   :  { %v32_v12 = vpop.permute.xlu0 %31   ;;  %v38_v13 = vpop.permute.xlu1 %37  }
  0x7d   :  { %34 = vst.msk [vmem:[#allocation0] sm:$0x1] %vm33_vm5, %v32_v12  }
  0x7e   :  { %40 = vst.msk [vmem:[#allocation0] sm:$0x1] %vm39_vm6, %v38_v13  }
  0x80   :  { %v44_v14 = vpop.permute.xlu0 %43  }
  0x81   :  { %46 = vst.msk [vmem:[#allocation0] sm:$0x1] %vm45_vm7, %v44_v14  }
  0x88   :  { %v50_v15 = vld [vmem:[#allocation0] sm:$0x1] }
  0x89   :  { %52 = vst [vmem:[%s112_s1] sm:$0x1] %v50_v15 }

// kernel: double_conv_forward.5
= control target key start
LH: loop header
LB: loop body
LE: loop exit
PB: predicated region body
PF: predicated region fallthrough
CT: control target
= control target key end

     0   :  { %s207_s0 = inlined_call_operand.vmem [shape: f32[64,128], index: 0, kind: input, shape index: {}]   ;;  %s208_s1 = inlined_call_operand.vmem [shape: f32[1,128], index: 1, kind: input, shape index: {}]   ;;  %s209_s2 = inlined_call_operand.vmem [shape: f32[1,128], index: 2, kind: input, shape index: {}]   ;;  %s210_s3 = inlined_call_operand.vmem [shape: bf16[64,128], index: 3, kind: output, shape index: {}]  }
   0x1   :  { %v14_v0 = vld [vmem:[%s207_s0] sm:$0xff]  ;;  %v15_v1 = vld [vmem:[%s207_s0 + $0x8] sm:$0xff]  ;;  %v16_v6 = vld [vmem:[%s207_s0 + $0x10] sm:$0xff] }
   0x2   :  { %v104_v2 = vld [vmem:[%s208_s1] ss:$0 sm:$0xff]  ;;  %v17_v7 = vld [vmem:[%s207_s0 + $0x18] sm:$0xff]  ;;  %v19_v11 = vld [vmem:[%s207_s0 + $0x28] sm:$0xff] }
   0x3   :  { %v29_v3 = vmul.f32 %v104_v2, %v14_v0  ;;  %v30_v4 = vmul.f32 %v104_v2, %v15_v1  ;;  %v105_v5 = vld [vmem:[%s209_s2] ss:$0 sm:$0xff]  ;;  %v31_v8 = vmul.f32 %v104_v2, %v16_v6  ;;  %v32_v9 = vmul.f32 %v104_v2, %v17_v7  ;;  %v20_v12 = vld [vmem:[%s207_s0 + $0x30] sm:$0xff]  ;;  %v21_v17 = vld [vmem:[%s207_s0 + $0x38] sm:$0xff] }
   0x4   :  { %v18_v10 = vld [vmem:[%s207_s0 + $0x20] sm:$0xff]  ;;  %v34_v16 = vmul.f32 %v104_v2, %v19_v11  ;;  %v35_v20 = vmul.f32 %v104_v2, %v20_v12  ;;  %v36_v21 = vmul.f32 %v104_v2, %v21_v17 }
   0x5   :  { %v44_v13 = vadd.f32 %v105_v5, %v29_v3  ;;  %v45_v14 = vadd.f32 %v105_v5, %v30_v4  ;;  %v33_v15 = vmul.f32 %v104_v2, %v18_v10  ;;  %v46_v18 = vadd.f32 %v105_v5, %v31_v8 }
   0x6   :  { %v47_v19 = vadd.f32 %v105_v5, %v32_v9  ;;  %v49_v25 = vadd.f32 %v105_v5, %v34_v16  ;;  %v50_v28 = vadd.f32 %v105_v5, %v35_v20  ;;  %v51_v29 = vadd.f32 %v105_v5, %v36_v21 }
   0x7   :  { %v52_v22 = vmax.f32 %v44_v13, 0.0  ;;  %v53_v23 = vmax.f32 %v45_v14, 0.0  ;;  %v48_v24 = vadd.f32 %v105_v5, %v33_v15  ;;  %v54_v26 = vmax.f32 %v46_v18, 0.0 }
   0x8   :  { %v55_v27 = vmax.f32 %v47_v19, 0.0  ;;  %v57_v32 = vmax.f32 %v49_v25, 0.0  ;;  %v58_v34 = vmax.f32 %v50_v28, 0.0  ;;  %v59_v35 = vmax.f32 %v51_v29, 0.0 }
   0x9   :  { %v125_v30 = vpack.c.bf16 %v53_v23, %v52_v22  ;;  %v56_v31 = vmax.f32 %v48_v24, 0.0 }
   0xa   :  { %v130_v33 = vpack.c.bf16 %v55_v27, %v54_v26  ;;  %v140_v37 = vpack.c.bf16 %v59_v35, %v58_v34 }
   0xb   :  { %126 = vst [vmem:[%s210_s3] sm:$0xff] %v125_v30   ;;  %v135_v36 = vpack.c.bf16 %v57_v32, %v56_v31 }
   0xc   :  { %142 = vst [vmem:[%s210_s3 + $0x8] sm:$0xff] %v130_v33   ;;  %144 = vst [vmem:[%s210_s3 + $0x18] sm:$0xff] %v140_v37  }
   0xd   :  { %143 = vst [vmem:[%s210_s3 + $0x10] sm:$0xff] %v135_v36  }

// kernel: double_conv_forward.4
= control target key start
LH: loop header
LB: loop body
LE: loop exit
PB: predicated region body
PF: predicated region fallthrough
CT: control target
= control target key end

     0   :  { %s1475_s15 = smov 0   ;;  %s1477_s16 = smov 0   ;;  %s1667_s0 = inlined_call_operand.vmem [shape: bf16[2,2,160,12], index: 0, kind: input, shape index: {}]   ;;  %s1668_s1 = inlined_call_operand.vmem [shape: bf16[3,12,16], index: 1, kind: input, shape index: {}]   ;;  %s1669_s2 = inlined_call_operand.vmem [shape: f32[2,2,128,16], index: 2, kind: output, shape index: {0}]   ;;  %s1670_s3 = inlined_call_operand.vmem [shape: f32[2,2,1,16], index: 3, kind: output, shape index: {1}]   ;;  %s1671_s4 = inlined_call_operand.vmem [shape: f32[2,2,1,16], index: 4, kind: output, shape index: {2}]  }
   0x1   :  { %s1479_s17 = smov 0   ;;  %s1481_s18 = smov 0  }
   0x2   :  { %s1483_s19 = smov 0  }
   0x3 LB: > { %s30_s20 = sadd.s32 1, %s1440_s17  ;;  %s34_s21 = sadd.s32 1, %s1444_s18  ;;  %s1448_s19 = sphi %s1483_s19, %s15_s19   ;;  %s1444_s18 = sphi %s1481_s18, %s1675_s18   ;;  %s1440_s17 = sphi %s1479_s17, %s1674_s17   ;;  %s1436_s16 = sphi %s1477_s16, %s1673_s16   ;;  %s1432_s15 = sphi %s1475_s15, %s1672_s15  }
   0x4   : > { %p32_p0 = scmp.ge.s32.totalorder %s30_s20, 2  ;;  %p1172_p1 = scmp.ge.s32.totalorder %s1448_s19, 1 }
   0x5   : > { %p213_p2 = scmp.lt.s32.totalorder %s1448_s19, 5 }
   0x6   : > { %s1677_s20 = smov (%p32_p0, %s30_s20), 0  ;;  %s1679_s21 = smov (!%p32_p0, %s34_s21), %s1444_s18 }
   0x7   : > { %p214_p3 = pnand %p1172_p1, %p213_p2  ;;  %p36_p4 = scmp.ge.s32.totalorder %s1679_s21, 2 }
   0x8   : > { %v1390_v0 = vld [vmem:[%s1668_s1 + $0x8] sm:$0x3f] (!%p214_p3)   ;;  %vm413_vm0 = vcmask (!%p214_p3), 1045504   ;;  %p274_p5 = scmp.lt.s32.totalorder (!%p214_p3), %s1436_s16, 1  ;;  %v1391_v1 = vld [vmem:[%s1668_s1] sm:$0x3f] (!%p214_p3)  }
   0x9   : > { %s1681_s21 = smov (%p36_p4, %s1679_s21), 0  ;;  %217 = sbr.rel (%p214_p3) target bundleno = 304 (0x130), region = 28 }
   0xa   : > { %1344 = vmatprep.subr.msk.bf16.mxu1 (!%p214_p3), %vm413_vm0, %v1390_v0  ;;  %v415_v2 = vsel (!%p214_p3), %vm413_vm0, %v1390_v0, 0  ;;  %p276_p6 = scmp.lt.s32.totalorder (!%p214_p3), %s1432_s15, 1  ;;  %1345 = vmatprep.subr.msk.bf16.mxu0 (!%p214_p3), %vm413_vm0, %v1391_v1  ;;  %v528_v3 = vsel (!%p214_p3), %vm413_vm0, %v1391_v1, 0  ;;  %v1394_v4 = vld [vmem:[%s1668_s1 + $0x10] sm:$0x3f] (!%p214_p3)   ;;  %vm388_vm1 = vcmask (!%p214_p3), 97280  }
   0xb   : > { %1257 = vmatpush3.bf16.msra.mxu1 (!%p214_p3), %v415_v2  ;;  %1275 = vmatpush3.bf16.msra.mxu0 (!%p214_p3), %v528_v3  ;;  %v716_v8 = vsel (!%p214_p3), %vm413_vm0, %v1394_v4, 0  ;;  %vm831_vm2 = vcmask (!%p214_p3), 130048   ;;  %vm885_vm3 = vcmask (!%p214_p3), 122880  }
   0xc   : > { %1346 = vmatprep.subr.msk.bf16.mxu1 (!%p214_p3), %vm413_vm0, %v1391_v1  ;;  %1347 = vmatprep.subr.msk.bf16.mxu0 (!%p214_p3), %vm413_vm0, %v1394_v4 }
  0x10   : > { %s1683_s16 = smov (!%p274_p5, %s1436_s16), 1  ;;  %s1685_s15 = smov (!%p276_p6, %s1432_s15), 1 }
  0x11   : > { %s1349_s28 = smul.u32 40, %s1683_s16  ;;  %s1174_s9 = sshll.u32 %s1685_s15, 4 }
  0x12   : > { %s1348_s29 = smul.u32 20, %s1685_s15  ;;  %s1175_s10 = sshll.u32 %s1683_s16, 5 }
  0x13   : > { %s296_s11 = sadd.s32 %s1175_s10, %s1174_s9  ;;  %s1177_s23 = sshll.u32 %s1683_s16, 1 }
  0x14   : > { %s280_s30 = sadd.s32 %s1349_s28, %s1348_s29  ;;  %s1176_s12 = sshll.u32 %s296_s11, 3 }
  0x15   : > { %s1173_s5 = sshll.u32 %s280_s30, 2  ;;  %s1578_s22 = scalar_lea.vmem %s1669_s2, %s1176_s12 }
  0x16   : > { %s1529_s8 = scalar_lea.vmem %s1667_s0, %s1173_s5  ;;  %s307_s24 = sadd.s32 %s1177_s23, %s1685_s15 }
  0x17   : > { %v1392_v5 = vld [vmem:[%s1529_s8 + $0x8] sm:$0xff]   ;;  %v1393_v6 = vld [vmem:[%s1529_s8] sm:$0xff]   ;;  %v1395_v7 = vld [vmem:[%s1529_s8 + $0x10] sm:$0xff]   ;;  %s308_s27 = scalar_lea.vmem %s1670_s3, %s307_s24  ;;  %s318_s30 = scalar_lea.vmem %s1671_s4, %s307_s24 }
  0x18   : > { %1258 = vmatprep.mubr.msk.bf16.mxu1 %vm388_vm1, %v1392_v5  ;;  %1276 = vmatprep.mubr.msk.bf16.mxu0 %vm388_vm1, %v1393_v6  ;;  %v1396_v9 = vld [vmem:[%s1529_s8 + $0x18] sm:$0xff]   ;;  %v1397_v10 = vld [vmem:[%s1529_s8 + $0x20] sm:$0xff]   ;;  %v1398_v11 = vld [vmem:[%s1529_s8 + $0x28] sm:$0xff]  }
  0x19   : > { %1259 = vmatmul.mubr.msk.bf16.vlgmr.msra.gmra.mrb[0].mxu1 %vm388_vm1, %v1395_v7  ;;  %1277 = vmatmul.mubr.msk.bf16.vlgmr.msra.gmra.mrb[0].mxu0 %vm388_vm1, %v1392_v5  ;;  %v1399_v12 = vld [vmem:[%s1529_s8 + $0x10] sm:$0xff]   ;;  %v1401_v14 = vld [vmem:[%s1529_s8 + $0x18] sm:$0xff]   ;;  %v1403_v16 = vld [vmem:[%s1529_s8 + $0x20] sm:$0xff]  }
  0x1a   : > { %1311 = vmatpush3.bf16.msra.mxu1 %v528_v3  ;;  %1293 = vmatpush3.bf16.msra.mxu0 %v716_v8  ;;  %v1400_v13 = vld [vmem:[%s1529_s8 + $0x30] sm:$0xff]   ;;  %v1402_v15 = vld [vmem:[%s1529_s8 + $0x38] sm:$0xff]   ;;  %v1404_v17 = vld [vmem:[%s1529_s8 + $0x40] sm:$0xff]  }
  0x1b   : > { %1262 = vmatprep.mubr.msk.bf16.mxu1 %vm388_vm1, %v1396_v9  ;;  %1280 = vmatprep.mubr.msk.bf16.mxu0 %vm388_vm1, %v1395_v7  ;;  %v1405_v18 = vld [vmem:[%s1529_s8 + $0x28] sm:$0xff]   ;;  %v1406_v19 = vld [vmem:[%s1529_s8 + $0x30] sm:$0xff]   ;;  %v1407_v20 = vld [vmem:[%s1529_s8 + $0x38] sm:$0xff]  }
  0x1c   : > { %v1408_v21 = vld [vmem:[%s1529_s8 + $0x40] sm:$0xff]   ;;  %v1409_v22 = vld [vmem:[%s1529_s8 + $0x48] sm:$0xff]  }
  0x21   : > { %1263 = vmatmul.mubr.msk.bf16.gmra.mrb[4].mxu1 %vm388_vm1, %v1397_v10  ;;  %1281 = vmatmul.mubr.msk.bf16.gmra.mrb[4].mxu0 %vm388_vm1, %v1396_v9 }
  0x22   : > { %1266 = vmatprep.mubr.msk.bf16.mxu1 %vm388_vm1, %v1398_v11  ;;  %1294 = vmatprep.mubr.msk.bf16.mxu0 %vm388_vm1, %v1399_v12 }
  0x29   : > { %1267 = vmatmul.mubr.msk.bf16.gmra.mrb[8].mxu1 %vm388_vm1, %v1400_v13  ;;  %1295 = vmatmul.mubr.msk.bf16.vlgmr.msra.gmra.mrb[0].mxu0 %vm388_vm1, %v1401_v14 }
  0x2a   : > { %1270 = vmatprep.mubr.msk.bf16.mxu1 %vm388_vm1, %v1402_v15  ;;  %1298 = vmatprep.mubr.msk.bf16.mxu0 %vm388_vm1, %v1403_v16 }
  0x31   : > { %1271 = vmatmul.mubr.msk.bf16.gmra.mrb[12].mxu1 %vm388_vm1, %v1404_v17  ;;  %1299 = vmatmul.mubr.msk.bf16.gmra.mrb[4].mxu0 %vm388_vm1, %v1405_v18 }
  0x32   : > { %1284 = vmatprep.mubr.msk.bf16.mxu1 %vm388_vm1, %v1397_v10  ;;  %1302 = vmatprep.mubr.msk.bf16.mxu0 %vm388_vm1, %v1406_v19 }
  0x39   : > { %1285 = vmatmul.mubr.msk.bf16.vlgmr.msra.gmra.mrb[8].mxu1 %vm388_vm1, %v1398_v11  ;;  %1303 = vmatmul.mubr.msk.bf16.gmra.mrb[8].mxu0 %vm388_vm1, %v1407_v20 }
  0x3a   : > { %1288 = vmatprep.mubr.msk.bf16.mxu1 %vm388_vm1, %v1400_v13  ;;  %1306 = vmatprep.mubr.msk.bf16.mxu0 %vm388_vm1, %v1408_v21 }
  0x41   : > { %1289 = vmatmul.mubr.msk.bf16.gmra.mrb[12].mxu1 %vm388_vm1, %v1402_v15  ;;  %1307 = vmatmul.mubr.msk.bf16.gmra.mrb[12].mxu0 %vm388_vm1, %v1409_v22 }
  0xec   : > { %v1260_v23 = vpop.f32.mrb[0].mxu1 }
  0xed   : > { %v451_v24 = vpop.f32.mrb[1].mxu1 }
  0xee   : > { %v1261_v25 = vpop.f32.mrb[2].mxu1 }
  0xef   : > { %v454_v26 = vpop.f32.mrb[3].mxu1 }
  0xf4   : > { %v1264_v27 = vpop.f32.mrb[4].mxu1 }
  0xf5   : > { %v467_v28 = vpop.f32.mrb[5].mxu1 }
  0xf6   : > { %v1265_v29 = vpop.f32.mrb[6].mxu1 }
  0xf7   : > { %v470_v30 = vpop.f32.mrb[7].mxu1 }
  0xfc   : > { %v1296_v31 = vpop.f32.mrb[0].mxu0 }
  0xfd   : > { %v1312_v32 = vadd.f32 %v1296_v31, %v1260_v23  ;;  %v752_v33 = vpop.f32.mrb[1].mxu0 }
  0xfe   : > { %v1313_v34 = vadd.f32 %v752_v33, %v451_v24  ;;  %v1297_v35 = vpop.f32.mrb[2].mxu0 }
  0xff   : > { %834 = vst.msk [vmem:[%s1578_s22 + $0x10] sm:$0xff] %vm831_vm2, %v1312_v32  ;;  %v1314_v36 = vadd.f32 %v1297_v35, %v1261_v25  ;;  %v755_v37 = vpop.f32.mrb[3].mxu0  ;;  %v889_v40 = vmul.f32 %v1312_v32, %v1312_v32  ;;  %v851_v46 = vsel %vm831_vm2, %v1312_v32, 0.0 }
 0x100   : > { %832 = vst.msk [vmem:[%s1578_s22] sm:$0xff] %vm831_vm2, %v1313_v34  ;;  %v887_v38 = vmul.f32 %v1313_v34, %v1313_v34  ;;  %v1315_v39 = vadd.f32 %v755_v37, %v454_v26  ;;  %v848_v41 = vsel %vm831_vm2, %v1313_v34, 0.0 }
 0x101   : > { %835 = vst.msk [vmem:[%s1578_s22 + $0x18] sm:$0xff] %vm831_vm2, %v1314_v36  ;;  %v890_v44 = vmul.f32 %v1314_v36, %v1314_v36  ;;  %v906_v54 = vsel %vm831_vm2, %v889_v40, 0.0  ;;  %v853_v55 = vsel %vm831_vm2, %v1314_v36, 0.0 }
 0x102   : > { %833 = vst.msk [vmem:[%s1578_s22 + $0x8] sm:$0xff] %vm831_vm2, %v1315_v39  ;;  %v849_v42 = vsel %vm831_vm2, %v1315_v39, 0.0  ;;  %v888_v43 = vmul.f32 %v1315_v39, %v1315_v39  ;;  %v903_v47 = vsel %vm831_vm2, %v887_v38, 0.0 }
 0x103   : > { %v850_v45 = vadd.f32 %v849_v42, %v848_v41  ;;  %v908_v58 = vsel %vm831_vm2, %v890_v44, 0.0 }
 0x104   : > { %v904_v48 = vsel %vm831_vm2, %v888_v43, 0.0  ;;  %v1300_v49 = vpop.f32.mrb[4].mxu0 }
 0x105   : > { %v852_v50 = vadd.f32 %v851_v46, %v850_v45  ;;  %v905_v51 = vadd.f32 %v904_v48, %v903_v47  ;;  %v1316_v52 = vadd.f32 %v1300_v49, %v1264_v27  ;;  %v768_v53 = vpop.f32.mrb[5].mxu0 }
 0x106   : > { %v1317_v56 = vadd.f32 %v768_v53, %v467_v28  ;;  %v1301_v57 = vpop.f32.mrb[6].mxu0 }
 0x107   : > { %v907_v59 = vadd.f32 %v906_v54, %v905_v51  ;;  %838 = vst.msk [vmem:[%s1578_s22 + $0x30] sm:$0xff] %vm831_vm2, %v1316_v52  ;;  %v854_v60 = vadd.f32 %v853_v55, %v852_v50  ;;  %v771_v61 = vpop.f32.mrb[7].mxu0  ;;  %v1318_v0 = vadd.f32 %v1301_v57, %v1265_v29  ;;  %v893_v6 = vmul.f32 %v1316_v52, %v1316_v52 }
 0x108   : > { %836 = vst.msk [vmem:[%s1578_s22 + $0x20] sm:$0xff] %vm831_vm2, %v1317_v56  ;;  %v855_v62 = vsel %vm831_vm2, %v1317_v56, 0.0  ;;  %v891_v63 = vmul.f32 %v1317_v56, %v1317_v56  ;;  %v1319_v1 = vadd.f32 %v771_v61, %v470_v30  ;;  %v859_v10 = vsel %vm831_vm2, %v1316_v52, 0.0 }
 0x109   : > { %v856_v2 = vadd.f32 %v855_v62, %v854_v60  ;;  %v909_v3 = vadd.f32 %v908_v58, %v907_v59  ;;  %839 = vst.msk [vmem:[%s1578_s22 + $0x38] sm:$0xff] %vm831_vm2, %v1318_v0  ;;  %v894_v13 = vmul.f32 %v1318_v0, %v1318_v0  ;;  %v861_v19 = vsel %vm831_vm2, %v1318_v0, 0.0 }
 0x10a   : > { %v910_v4 = vsel %vm831_vm2, %v891_v63, 0.0  ;;  %837 = vst.msk [vmem:[%s1578_s22 + $0x28] sm:$0xff] %vm831_vm2, %v1319_v1  ;;  %v857_v5 = vsel %vm831_vm2, %v1319_v1, 0.0  ;;  %v892_v9 = vmul.f32 %v1319_v1, %v1319_v1  ;;  %v914_v24 = vsel %vm831_vm2, %v893_v6, 0.0 }
 0x10b   : > { %v911_v7 = vadd.f32 %v910_v4, %v909_v3  ;;  %v858_v8 = vadd.f32 %v857_v5, %v856_v2  ;;  %v916_v33 = vsel %vm831_vm2, %v894_v13, 0.0 }
 0x10c   : > { %v1286_v11 = vpop.f32.mrb[8].mxu1  ;;  %v1304_v12 = vpop.f32.mrb[8].mxu0  ;;  %v912_v15 = vsel %vm831_vm2, %v892_v9, 0.0 }
 0x10d   : > { %v860_v14 = vadd.f32 %v859_v10, %v858_v8  ;;  %v1320_v16 = vadd.f32 %v1304_v12, %v1286_v11  ;;  %v596_v17 = vpop.f32.mrb[9].mxu1  ;;  %v784_v18 = vpop.f32.mrb[9].mxu0  ;;  %v913_v20 = vadd.f32 %v912_v15, %v911_v7 }
 0x10e   : > { %v1321_v21 = vadd.f32 %v784_v18, %v596_v17  ;;  %v1287_v22 = vpop.f32.mrb[10].mxu1  ;;  %v1305_v23 = vpop.f32.mrb[10].mxu0 }
 0x10f   : > { %842 = vst.msk [vmem:[%s1578_s22 + $0x50] sm:$0xff] %vm831_vm2, %v1320_v16  ;;  %v862_v25 = vadd.f32 %v861_v19, %v860_v14  ;;  %v1322_v26 = vadd.f32 %v1305_v23, %v1287_v22  ;;  %v599_v27 = vpop.f32.mrb[11].mxu1  ;;  %v787_v28 = vpop.f32.mrb[11].mxu0  ;;  %v915_v29 = vadd.f32 %v914_v24, %v913_v20  ;;  %v897_v39 = vmul.f32 %v1320_v16, %v1320_v16 }
 0x110   : > { %840 = vst.msk [vmem:[%s1578_s22 + $0x40] sm:$0xff] %vm831_vm2, %v1321_v21  ;;  %v863_v30 = vsel %vm831_vm2, %v1321_v21, 0.0  ;;  %v895_v31 = vmul.f32 %v1321_v21, %v1321_v21  ;;  %v1323_v32 = vadd.f32 %v787_v28, %v599_v27  ;;  %v867_v41 = vsel %vm831_vm2, %v1320_v16, 0.0 }
 0x111   : > { %v864_v34 = vadd.f32 %v863_v30, %v862_v25  ;;  %843 = vst.msk [vmem:[%s1578_s22 + $0x58] sm:$0xff] %vm831_vm2, %v1322_v26  ;;  %v917_v35 = vadd.f32 %v916_v33, %v915_v29  ;;  %v898_v46 = vmul.f32 %v1322_v26, %v1322_v26  ;;  %v869_v51 = vsel %vm831_vm2, %v1322_v26, 0.0 }
 0x112   : > { %v918_v36 = vsel %vm831_vm2, %v895_v31, 0.0  ;;  %841 = vst.msk [vmem:[%s1578_s22 + $0x48] sm:$0xff] %vm831_vm2, %v1323_v32  ;;  %v865_v37 = vsel %vm831_vm2, %v1323_v32, 0.0  ;;  %v896_v38 = vmul.f32 %v1323_v32, %v1323_v32  ;;  %v922_v56 = vsel %vm831_vm2, %v897_v39, 0.0 }
 0x113   : > { %v866_v40 = vadd.f32 %v865_v37, %v864_v34  ;;  %v919_v42 = vadd.f32 %v918_v36, %v917_v35  ;;  %v924_v1 = vsel %vm831_vm2, %v898_v46, 0.0 }
 0x114   : > { %v920_v43 = vsel %vm831_vm2, %v896_v38, 0.0  ;;  %v1290_v44 = vpop.f32.mrb[12].mxu1  ;;  %v1308_v45 = vpop.f32.mrb[12].mxu0 }
 0x115   : > { %v868_v47 = vadd.f32 %v867_v41, %v866_v40  ;;  %v1324_v48 = vadd.f32 %v1308_v45, %v1290_v44  ;;  %v612_v49 = vpop.f32.mrb[13].mxu1  ;;  %v800_v50 = vpop.f32.mrb[13].mxu0  ;;  %v921_v52 = vadd.f32 %v920_v43, %v919_v42 }
 0x116   : > { %v1325_v53 = vadd.f32 %v800_v50, %v612_v49  ;;  %v1291_v54 = vpop.f32.mrb[14].mxu1  ;;  %v1309_v55 = vpop.f32.mrb[14].mxu0 }
 0x117   : > { %846 = vst.msk [vmem:[%s1578_s22 + $0x70] sm:$0xff] %vm831_vm2, %v1324_v48  ;;  %v870_v57 = vadd.f32 %v869_v51, %v868_v47  ;;  %v1326_v58 = vadd.f32 %v1309_v55, %v1291_v54  ;;  %v615_v59 = vpop.f32.mrb[15].mxu1  ;;  %v803_v60 = vpop.f32.mrb[15].mxu0  ;;  %v923_v61 = vadd.f32 %v922_v56, %v921_v52  ;;  %v901_v7 = vmul.f32 %v1324_v48, %v1324_v48 }
 0x118   : > { %844 = vst.msk [vmem:[%s1578_s22 + $0x60] sm:$0xff] %vm831_vm2, %v1325_v53  ;;  %v871_v62 = vsel %vm831_vm2, %v1325_v53, 0.0  ;;  %v899_v63 = vmul.f32 %v1325_v53, %v1325_v53  ;;  %v1327_v0 = vadd.f32 %v803_v60, %v615_v59  ;;  %v875_v9 = vsel %vm831_vm2, %v1324_v48, 0.0 }
 0x119   : > { %v872_v2 = vadd.f32 %v871_v62, %v870_v57  ;;  %847 = vst.msk [vmem:[%s1578_s22 + $0x78] sm:$0xff] %vm831_vm2, %v1326_v58  ;;  %v925_v3 = vadd.f32 %v924_v1, %v923_v61  ;;  %v902_v12 = vmul.f32 %v1326_v58, %v1326_v58  ;;  %v877_v14 = vsel %vm831_vm2, %v1326_v58, 0.0 }
 0x11a   : > { %v926_v4 = vsel %vm831_vm2, %v899_v63, 0.0  ;;  %845 = vst.msk [vmem:[%s1578_s22 + $0x68] sm:$0xff] %vm831_vm2, %v1327_v0  ;;  %v873_v5 = vsel %vm831_vm2, %v1327_v0, 0.0  ;;  %v900_v6 = vmul.f32 %v1327_v0, %v1327_v0  ;;  %v930_v16 = vsel %vm831_vm2, %v901_v7, 0.0 }
 0x11b   : > { %v874_v8 = vadd.f32 %v873_v5, %v872_v2  ;;  %v927_v10 = vadd.f32 %v926_v4, %v925_v3  ;;  %v932_v19 = vsel %vm831_vm2, %v902_v12, 0.0 }
 0x11c   : > { %v928_v11 = vsel %vm831_vm2, %v900_v6, 0.0 }
 0x11d   : > { %v876_v13 = vadd.f32 %v875_v9, %v874_v8  ;;  %v929_v15 = vadd.f32 %v928_v11, %v927_v10 }
 0x11f   : > { %v878_v17 = vadd.f32 %v877_v14, %v876_v13  ;;  %v931_v18 = vadd.f32 %v930_v16, %v929_v15 }
 0x121   : > { %v879_v20 = vrot.slane %v878_v17, 4  ;;  %v933_v21 = vadd.f32 %v932_v19, %v931_v18 }
 0x123   : > { %v880_v22 = vadd.f32 %v879_v20, %v878_v17  ;;  %v934_v23 = vrot.slane %v933_v21, 4 }
 0x125   : > { %v881_v24 = vrot.slane %v880_v22, 2  ;;  %v935_v25 = vadd.f32 %v934_v23, %v933_v21 }
 0x127   : > { %v882_v26 = vadd.f32 %v881_v24, %v880_v22  ;;  %v936_v27 = vrot.slane %v935_v25, 2 }
 0x129   : > { %v883_v28 = vrot.slane %v882_v26, 1  ;;  %v937_v29 = vadd.f32 %v936_v27, %v935_v25 }
 0x12b   : > { %v884_v30 = vadd.f32 %v883_v28, %v882_v26  ;;  %v938_v31 = vrot.slane %v937_v29, 1 }
 0x12d   : > { %886 = vst.msk [vmem:[%s308_s27] sm:$0x1] %vm885_vm3, %v884_v30  ;;  %v939_v32 = vadd.f32 %v938_v31, %v937_v29 }
 0x12f   : > { %940 = vst.msk [vmem:[%s318_s30] sm:$0x1] %vm885_vm3, %v939_v32 }
 0x130 PF: > { %s15_s19 = sadd.s32 1, %s1448_s19   ;;  %s1672_s15 = smov %s1440_s17 }
 0x131   : > { %p12_p7 = scmp.ge.s32.totalorder %s15_s19, 6   ;;  %s1673_s16 = smov %s1444_s18 }
 0x132   : > { %s1674_s17 = smov %s1677_s20  ;;  %s1675_s18 = smov %s1681_s21 }
 0x133   :  { %14 = sbr.rel (!%p12_p7) target bundleno = 3 (0x3), region = 87 }

// kernel: double_conv_forward.7
= control target key start
LH: loop header
LB: loop body
LE: loop exit
PB: predicated region body
PF: predicated region fallthrough
CT: control target
= control target key end

     0   :  { %s148_s0 = inlined_call_operand.vmem [shape: f32[64,128], index: 0, kind: input, shape index: {}]   ;;  %s149_s1 = inlined_call_operand.vmem [shape: f32[1,128], index: 1, kind: input, shape index: {}]   ;;  %s150_s2 = inlined_call_operand.vmem [shape: f32[1,128], index: 2, kind: input, shape index: {}]   ;;  %s151_s3 = inlined_call_operand.vmem [shape: f32[64,128], index: 3, kind: output, shape index: {}]  }
   0x1   :  { %v14_v0 = vld [vmem:[%s148_s0] sm:$0xff]  ;;  %v15_v4 = vld [vmem:[%s148_s0 + $0x8] sm:$0xff]  ;;  %v16_v5 = vld [vmem:[%s148_s0 + $0x10] sm:$0xff] }
   0x2   :  { %v72_v1 = vld [vmem:[%s149_s1] ss:$0 sm:$0xff]  ;;  %v17_v6 = vld [vmem:[%s148_s0 + $0x18] sm:$0xff]  ;;  %v19_v11 = vld [vmem:[%s148_s0 + $0x28] sm:$0xff] }
   0x3   :  { %v73_v2 = vld [vmem:[%s150_s2] ss:$0 sm:$0xff]  ;;  %v29_v3 = vmul.f32 %v72_v1, %v14_v0  ;;  %v30_v7 = vmul.f32 %v72_v1, %v15_v4  ;;  %v31_v8 = vmul.f32 %v72_v1, %v16_v5  ;;  %v32_v9 = vmul.f32 %v72_v1, %v17_v6  ;;  %v20_v12 = vld [vmem:[%s148_s0 + $0x30] sm:$0xff]  ;;  %v21_v17 = vld [vmem:[%s148_s0 + $0x38] sm:$0xff] }
   0x4   :  { %v18_v10 = vld [vmem:[%s148_s0 + $0x20] sm:$0xff]  ;;  %v34_v15 = vmul.f32 %v72_v1, %v19_v11  ;;  %v35_v16 = vmul.f32 %v72_v1, %v20_v12  ;;  %v36_v21 = vmul.f32 %v72_v1, %v21_v17 }
   0x5   :  { %v44_v13 = vadd.f32 %v73_v2, %v29_v3  ;;  %v33_v14 = vmul.f32 %v72_v1, %v18_v10  ;;  %v45_v18 = vadd.f32 %v73_v2, %v30_v7  ;;  %v46_v19 = vadd.f32 %v73_v2, %v31_v8 }
   0x6   :  { %v47_v20 = vadd.f32 %v73_v2, %v32_v9  ;;  %v49_v24 = vadd.f32 %v73_v2, %v34_v15  ;;  %v50_v25 = vadd.f32 %v73_v2, %v35_v16  ;;  %v51_v29 = vadd.f32 %v73_v2, %v36_v21 }
   0x7   :  { %v52_v22 = vmax.f32 %v44_v13, 0.0  ;;  %v48_v23 = vadd.f32 %v73_v2, %v33_v14  ;;  %v53_v26 = vmax.f32 %v45_v18, 0.0  ;;  %v54_v27 = vmax.f32 %v46_v19, 0.0 }
   0x8   :  { %v55_v28 = vmax.f32 %v47_v20, 0.0  ;;  %v57_v31 = vmax.f32 %v49_v24, 0.0  ;;  %v58_v32 = vmax.f32 %v50_v25, 0.0  ;;  %v59_v33 = vmax.f32 %v51_v29, 0.0 }
   0x9   :  { %60 = vst [vmem:[%s151_s3] sm:$0xff] %v52_v22  ;;  %v56_v30 = vmax.f32 %v48_v23, 0.0  ;;  %61 = vst [vmem:[%s151_s3 + $0x8] sm:$0xff] %v53_v26 }
   0xa   :  { %62 = vst [vmem:[%s151_s3 + $0x10] sm:$0xff] %v54_v27  ;;  %63 = vst [vmem:[%s151_s3 + $0x18] sm:$0xff] %v55_v28 }
   0xb   :  { %64 = vst [vmem:[%s151_s3 + $0x20] sm:$0xff] %v56_v30  ;;  %65 = vst [vmem:[%s151_s3 + $0x28] sm:$0xff] %v57_v31 }
   0xc   :  { %66 = vst [vmem:[%s151_s3 + $0x30] sm:$0xff] %v58_v32  ;;  %67 = vst [vmem:[%s151_s3 + $0x38] sm:$0xff] %v59_v33 }

// kernel: double_conv_forward.6
= control target key start
LH: loop header
LB: loop body
LE: loop exit
PB: predicated region body
PF: predicated region fallthrough
CT: control target
= control target key end

     0   :  { %s1554_s15 = smov 0   ;;  %s1556_s16 = smov 0   ;;  %s1757_s0 = inlined_call_operand.vmem [shape: bf16[2,2,160,48], index: 0, kind: input, shape index: {}]   ;;  %s1758_s1 = inlined_call_operand.vmem [shape: bf16[3,48,16], index: 1, kind: input, shape index: {}]   ;;  %s1759_s2 = inlined_call_operand.vmem [shape: f32[2,2,128,16], index: 2, kind: output, shape index: {0}]   ;;  %s1760_s3 = inlined_call_operand.vmem [shape: f32[2,2,1,16], index: 3, kind: output, shape index: {1}]   ;;  %s1761_s4 = inlined_call_operand.vmem [shape: f32[2,2,1,16], index: 4, kind: output, shape index: {2}]  }
   0x1   :  { %s1558_s17 = smov 0   ;;  %s1560_s18 = smov 0  }
   0x2   :  { %s1562_s19 = smov 0  }
   0x3 LB: > { %s30_s20 = sadd.s32 1, %s1519_s17  ;;  %s34_s21 = sadd.s32 1, %s1523_s18  ;;  %s1527_s19 = sphi %s1562_s19, %s15_s19   ;;  %s1523_s18 = sphi %s1560_s18, %s1765_s18   ;;  %s1519_s17 = sphi %s1558_s17, %s1764_s17   ;;  %s1515_s16 = sphi %s1556_s16, %s1763_s16   ;;  %s1511_s15 = sphi %s1554_s15, %s1762_s15  }
   0x4   : > { %p32_p0 = scmp.ge.s32.totalorder %s30_s20, 2  ;;  %p1213_p1 = scmp.ge.s32.totalorder %s1527_s19, 1 }
   0x5   : > { %p213_p2 = scmp.lt.s32.totalorder %s1527_s19, 5 }
   0x6   : > { %s1767_s20 = smov (%p32_p0, %s30_s20), 0  ;;  %s1769_s21 = smov (!%p32_p0, %s34_s21), %s1523_s18 }
   0x7   : > { %p214_p3 = pnand %p1213_p1, %p213_p2  ;;  %p36_p4 = scmp.ge.s32.totalorder %s1769_s21, 2 }
   0x8   : > { %v1463_v0 = vld [vmem:[%s1758_s1 + $0x18] sm:$0xff] (!%p214_p3)   ;;  %p274_p5 = scmp.lt.s32.totalorder (!%p214_p3), %s1515_s16, 1  ;;  %v1464_v1 = vld [vmem:[%s1758_s1] sm:$0xff] (!%p214_p3)   ;;  %p276_p6 = scmp.lt.s32.totalorder (!%p214_p3), %s1511_s15, 1  ;;  %v1466_v3 = vld [vmem:[%s1758_s1 + $0x8] sm:$0xff] (!%p214_p3)   ;;  %vm409_vm0 = vcmask (!%p214_p3), 392192  }
   0x9   : > { %s1771_s21 = smov (%p36_p4, %s1769_s21), 0  ;;  %217 = sbr.rel (%p214_p3) target bundleno = 304 (0x130), region = 28 }
   0xa   : > { %1317 = vmatprep.subr.bf16.mxu1 (!%p214_p3), %v1463_v0  ;;  %v1465_v2 = vld [vmem:[%s1758_s1 + $0x20] sm:$0xff] (!%p214_p3)   ;;  %1339 = vmatprep.subr.bf16.mxu0 (!%p214_p3), %v1464_v1  ;;  %v1467_v4 = vld [vmem:[%s1758_s1 + $0x28] sm:$0xff] (!%p214_p3)   ;;  %v1468_v5 = vld [vmem:[%s1758_s1 + $0x10] sm:$0xff] (!%p214_p3)   ;;  %vm872_vm1 = vcmask (!%p214_p3), 130048   ;;  %vm926_vm2 = vcmask (!%p214_p3), 122880  }
   0xb   : > { %1318 = vmatpush3.bf16.msra.mxu1 (!%p214_p3), %v1463_v0  ;;  %1340 = vmatpush3.bf16.msra.mxu0 (!%p214_p3), %v1464_v1  ;;  %v1472_v6 = vld [vmem:[%s1758_s1 + $0x30] sm:$0xff] (!%p214_p3)   ;;  %v1473_v9 = vld [vmem:[%s1758_s1 + $0x38] sm:$0xff] (!%p214_p3)   ;;  %v1476_v12 = vld [vmem:[%s1758_s1 + $0x40] sm:$0xff] (!%p214_p3)  }
   0xc   : > { %1319 = vmatprep.subr.bf16.mxu1 (!%p214_p3), %v1465_v2  ;;  %1341 = vmatprep.subr.bf16.mxu0 (!%p214_p3), %v1466_v3 }
   0xf   : > { %1320 = vmatpush3.bf16.msra.mxu1 (!%p214_p3), %v1465_v2  ;;  %1342 = vmatpush3.bf16.msra.mxu0 (!%p214_p3), %v1466_v3 }
  0x10   : > { %s1773_s16 = smov (!%p274_p5, %s1515_s16), 1  ;;  %s1775_s15 = smov (!%p276_p6, %s1511_s15), 1  ;;  %1321 = vmatprep.subr.bf16.mxu1 %v1467_v4  ;;  %1343 = vmatprep.subr.bf16.mxu0 %v1468_v5 }
  0x11   : > { %s1422_s6 = smul.u32 40, %s1773_s16  ;;  %s1215_s28 = sshll.u32 %s1775_s15, 4 }
  0x12   : > { %s1421_s9 = smul.u32 20, %s1775_s15  ;;  %s1216_s29 = sshll.u32 %s1773_s16, 5 }
  0x13   : > { %1322 = vmatpush3.bf16.msra.mxu1 %v1467_v4  ;;  %1344 = vmatpush3.bf16.msra.mxu0 %v1468_v5  ;;  %s296_s30 = sadd.s32 %s1216_s29, %s1215_s28 }
  0x14   : > { %s280_s10 = sadd.s32 %s1422_s6, %s1421_s9  ;;  %1383 = vmatprep.subr.bf16.mxu1 %v1464_v1  ;;  %1361 = vmatprep.subr.bf16.mxu0 %v1472_v6  ;;  %s1217_s5 = sshll.u32 %s296_s30, 3 }
  0x15   : > { %s1214_s11 = sshll.u32 %s280_s10, 2  ;;  %s1668_s8 = scalar_lea.vmem %s1759_s2, %s1217_s5 }
  0x16   : > { %s1611_s14 = scalar_lea.vmem %s1757_s0, %s1214_s11  ;;  %s1218_s9 = sshll.u32 %s1773_s16, 1 }
  0x17   : > { %v1469_v7 = vld [vmem:[%s1611_s14 + $0x8] sm:$0xff]   ;;  %v1470_v8 = vld [vmem:[%s1611_s14] sm:$0xff]   ;;  %v1471_v10 = vld [vmem:[%s1611_s14 + $0x10] sm:$0xff]   ;;  %s307_s10 = sadd.s32 %s1218_s9, %s1775_s15 }
  0x18   : > { %1323 = vmatprep.mubr.msk.bf16.mxu1 %vm409_vm0, %v1469_v7  ;;  %1345 = vmatprep.mubr.msk.bf16.mxu0 %vm409_vm0, %v1470_v8  ;;  %v1474_v11 = vld [vmem:[%s1611_s14 + $0x18] sm:$0xff]   ;;  %v1475_v13 = vld [vmem:[%s1611_s14 + $0x20] sm:$0xff]   ;;  %v1477_v14 = vld [vmem:[%s1611_s14 + $0x28] sm:$0xff]   ;;  %s308_s13 = scalar_lea.vmem %s1760_s3, %s307_s10  ;;  %s318_s23 = scalar_lea.vmem %s1761_s4, %s307_s10 }
  0x19   : > { %1324 = vmatmul.mubr.msk.bf16.vlgmr.msra.gmra.mrb[0].mxu1 %vm409_vm0, %v1471_v10  ;;  %1346 = vmatmul.mubr.msk.bf16.vlgmr.msra.gmra.mrb[0].mxu0 %vm409_vm0, %v1469_v7  ;;  %v1478_v15 = vld [vmem:[%s1611_s14 + $0x10] sm:$0xff]   ;;  %v1480_v17 = vld [vmem:[%s1611_s14 + $0x18] sm:$0xff]   ;;  %v1482_v19 = vld [vmem:[%s1611_s14 + $0x20] sm:$0xff]  }
  0x1a   : > { %1386 = vmatpush3.bf16.msra.mxu1 %v1464_v1  ;;  %1362 = vmatpush3.bf16.msra.mxu0 %v1472_v6  ;;  %v1479_v16 = vld [vmem:[%s1611_s14 + $0x30] sm:$0xff]   ;;  %v1481_v18 = vld [vmem:[%s1611_s14 + $0x38] sm:$0xff]   ;;  %v1483_v20 = vld [vmem:[%s1611_s14 + $0x40] sm:$0xff]  }
  0x1b   : > { %1327 = vmatprep.mubr.msk.bf16.mxu1 %vm409_vm0, %v1474_v11  ;;  %1363 = vmatprep.subr.bf16.mxu0 %v1473_v9  ;;  %v1484_v21 = vld [vmem:[%s1611_s14 + $0x28] sm:$0xff]   ;;  %v1485_v22 = vld [vmem:[%s1611_s14 + $0x30] sm:$0xff]   ;;  %v1486_v23 = vld [vmem:[%s1611_s14 + $0x38] sm:$0xff]  }
  0x1c   : > { %1349 = vmatprep.mubr.msk.bf16.mxu0 %vm409_vm0, %v1471_v10  ;;  %1384 = vmatprep.subr.bf16.mxu1 %v1466_v3  ;;  %v1487_v24 = vld [vmem:[%s1611_s14 + $0x40] sm:$0xff]   ;;  %v1488_v25 = vld [vmem:[%s1611_s14 + $0x48] sm:$0xff]  }
  0x1e   : > { %1387 = vmatpush3.bf16.msra.mxu1 %v1466_v3  ;;  %1364 = vmatpush3.bf16.msra.mxu0 %v1473_v9 }
  0x1f   : > { %1385 = vmatprep.subr.bf16.mxu1 %v1468_v5  ;;  %1365 = vmatprep.subr.bf16.mxu0 %v1476_v12 }
  0x21   : > { %1328 = vmatmul.mubr.msk.bf16.gmra.mrb[4].mxu1 %vm409_vm0, %v1475_v13  ;;  %1350 = vmatmul.mubr.msk.bf16.gmra.mrb[4].mxu0 %vm409_vm0, %v1474_v11 }
  0x22   : > { %1331 = vmatprep.mubr.msk.bf16.mxu1 %vm409_vm0, %v1477_v14  ;;  %1366 = vmatpush3.bf16.msra.mxu0 %v1476_v12 }
  0x23   : > { %1367 = vmatprep.mubr.msk.bf16.mxu0 %vm409_vm0, %v1478_v15  ;;  %1388 = vmatpush3.bf16.msra.mxu1 %v1468_v5 }
  0x29   : > { %1332 = vmatmul.mubr.msk.bf16.gmra.mrb[8].mxu1 %vm409_vm0, %v1479_v16  ;;  %1368 = vmatmul.mubr.msk.bf16.vlgmr.msra.gmra.mrb[0].mxu0 %vm409_vm0, %v1480_v17 }
  0x2a   : > { %1335 = vmatprep.mubr.msk.bf16.mxu1 %vm409_vm0, %v1481_v18  ;;  %1371 = vmatprep.mubr.msk.bf16.mxu0 %vm409_vm0, %v1482_v19 }
  0x31   : > { %1336 = vmatmul.mubr.msk.bf16.gmra.mrb[12].mxu1 %vm409_vm0, %v1483_v20  ;;  %1372 = vmatmul.mubr.msk.bf16.gmra.mrb[4].mxu0 %vm409_vm0, %v1484_v21 }
  0x32   : > { %1353 = vmatprep.mubr.msk.bf16.mxu1 %vm409_vm0, %v1475_v13  ;;  %1375 = vmatprep.mubr.msk.bf16.mxu0 %vm409_vm0, %v1485_v22 }
  0x39   : > { %1354 = vmatmul.mubr.msk.bf16.vlgmr.msra.gmra.mrb[8].mxu1 %vm409_vm0, %v1477_v14  ;;  %1376 = vmatmul.mubr.msk.bf16.gmra.mrb[8].mxu0 %vm409_vm0, %v1486_v23 }
  0x3a   : > { %1357 = vmatprep.mubr.msk.bf16.mxu1 %vm409_vm0, %v1479_v16  ;;  %1379 = vmatprep.mubr.msk.bf16.mxu0 %vm409_vm0, %v1487_v24 }
  0x41   : > { %1358 = vmatmul.mubr.msk.bf16.gmra.mrb[12].mxu1 %vm409_vm0, %v1481_v18  ;;  %1380 = vmatmul.mubr.msk.bf16.gmra.mrb[12].mxu0 %vm409_vm0, %v1488_v25 }
  0xec   : > { %v1325_v26 = vpop.f32.mrb[0].mxu1 }
  0xed   : > { %v468_v27 = vpop.f32.mrb[1].mxu1 }
  0xee   : > { %v1326_v28 = vpop.f32.mrb[2].mxu1 }
  0xef   : > { %v471_v29 = vpop.f32.mrb[3].mxu1 }
  0xf4   : > { %v1329_v30 = vpop.f32.mrb[4].mxu1 }
  0xf5   : > { %v484_v31 = vpop.f32.mrb[5].mxu1 }
  0xf6   : > { %v1330_v32 = vpop.f32.mrb[6].mxu1 }
  0xf7   : > { %v487_v33 = vpop.f32.mrb[7].mxu1 }
  0xfc   : > { %v1369_v34 = vpop.f32.mrb[0].mxu0 }
  0xfd   : > { %v1389_v35 = vadd.f32 %v1369_v34, %v1325_v26  ;;  %v793_v36 = vpop.f32.mrb[1].mxu0 }
  0xfe   : > { %v1390_v37 = vadd.f32 %v793_v36, %v468_v27  ;;  %v1370_v38 = vpop.f32.mrb[2].mxu0 }
  0xff   : > { %875 = vst.msk [vmem:[%s1668_s8 + $0x10] sm:$0xff] %vm872_vm1, %v1389_v35  ;;  %v1391_v39 = vadd.f32 %v1370_v38, %v1326_v28  ;;  %v796_v40 = vpop.f32.mrb[3].mxu0  ;;  %v930_v43 = vmul.f32 %v1389_v35, %v1389_v35  ;;  %v892_v49 = vsel %vm872_vm1, %v1389_v35, 0.0 }
 0x100   : > { %873 = vst.msk [vmem:[%s1668_s8] sm:$0xff] %vm872_vm1, %v1390_v37  ;;  %v928_v41 = vmul.f32 %v1390_v37, %v1390_v37  ;;  %v1392_v42 = vadd.f32 %v796_v40, %v471_v29  ;;  %v889_v44 = vsel %vm872_vm1, %v1390_v37, 0.0 }
 0x101   : > { %876 = vst.msk [vmem:[%s1668_s8 + $0x18] sm:$0xff] %vm872_vm1, %v1391_v39  ;;  %v931_v47 = vmul.f32 %v1391_v39, %v1391_v39  ;;  %v947_v57 = vsel %vm872_vm1, %v930_v43, 0.0  ;;  %v894_v58 = vsel %vm872_vm1, %v1391_v39, 0.0 }
 0x102   : > { %874 = vst.msk [vmem:[%s1668_s8 + $0x8] sm:$0xff] %vm872_vm1, %v1392_v42  ;;  %v890_v45 = vsel %vm872_vm1, %v1392_v42, 0.0  ;;  %v929_v46 = vmul.f32 %v1392_v42, %v1392_v42  ;;  %v944_v50 = vsel %vm872_vm1, %v928_v41, 0.0 }
 0x103   : > { %v891_v48 = vadd.f32 %v890_v45, %v889_v44  ;;  %v949_v61 = vsel %vm872_vm1, %v931_v47, 0.0 }
 0x104   : > { %v945_v51 = vsel %vm872_vm1, %v929_v46, 0.0  ;;  %v1373_v52 = vpop.f32.mrb[4].mxu0 }
 0x105   : > { %v893_v53 = vadd.f32 %v892_v49, %v891_v48  ;;  %v946_v54 = vadd.f32 %v945_v51, %v944_v50  ;;  %v1393_v55 = vadd.f32 %v1373_v52, %v1329_v30  ;;  %v809_v56 = vpop.f32.mrb[5].mxu0 }
 0x106   : > { %v1394_v59 = vadd.f32 %v809_v56, %v484_v31  ;;  %v1374_v60 = vpop.f32.mrb[6].mxu0 }
 0x107   : > { %v948_v62 = vadd.f32 %v947_v57, %v946_v54  ;;  %879 = vst.msk [vmem:[%s1668_s8 + $0x30] sm:$0xff] %vm872_vm1, %v1393_v55  ;;  %v895_v63 = vadd.f32 %v894_v58, %v893_v53  ;;  %v812_v0 = vpop.f32.mrb[7].mxu0  ;;  %v1395_v3 = vadd.f32 %v1374_v60, %v1330_v32  ;;  %v934_v9 = vmul.f32 %v1393_v55, %v1393_v55 }
 0x108   : > { %877 = vst.msk [vmem:[%s1668_s8 + $0x20] sm:$0xff] %vm872_vm1, %v1394_v59  ;;  %v896_v1 = vsel %vm872_vm1, %v1394_v59, 0.0  ;;  %v932_v2 = vmul.f32 %v1394_v59, %v1394_v59  ;;  %v1396_v4 = vadd.f32 %v812_v0, %v487_v33  ;;  %v900_v14 = vsel %vm872_vm1, %v1393_v55, 0.0 }
 0x109   : > { %v897_v5 = vadd.f32 %v896_v1, %v895_v63  ;;  %v950_v6 = vadd.f32 %v949_v61, %v948_v62  ;;  %880 = vst.msk [vmem:[%s1668_s8 + $0x38] sm:$0xff] %vm872_vm1, %v1395_v3  ;;  %v935_v17 = vmul.f32 %v1395_v3, %v1395_v3  ;;  %v902_v23 = vsel %vm872_vm1, %v1395_v3, 0.0 }
 0x10a   : > { %v951_v7 = vsel %vm872_vm1, %v932_v2, 0.0  ;;  %878 = vst.msk [vmem:[%s1668_s8 + $0x28] sm:$0xff] %vm872_vm1, %v1396_v4  ;;  %v898_v8 = vsel %vm872_vm1, %v1396_v4, 0.0  ;;  %v933_v12 = vmul.f32 %v1396_v4, %v1396_v4  ;;  %v955_v28 = vsel %vm872_vm1, %v934_v9, 0.0 }
 0x10b   : > { %v952_v10 = vadd.f32 %v951_v7, %v950_v6  ;;  %v899_v11 = vadd.f32 %v898_v8, %v897_v5  ;;  %v957_v36 = vsel %vm872_vm1, %v935_v17, 0.0 }
 0x10c   : > { %v1355_v13 = vpop.f32.mrb[8].mxu1  ;;  %v1377_v15 = vpop.f32.mrb[8].mxu0  ;;  %v953_v19 = vsel %vm872_vm1, %v933_v12, 0.0 }
 0x10d   : > { %v623_v16 = vpop.f32.mrb[9].mxu1  ;;  %v901_v18 = vadd.f32 %v900_v14, %v899_v11  ;;  %v1397_v20 = vadd.f32 %v1377_v15, %v1355_v13  ;;  %v825_v21 = vpop.f32.mrb[9].mxu0  ;;  %v954_v24 = vadd.f32 %v953_v19, %v952_v10 }
 0x10e   : > { %v1356_v22 = vpop.f32.mrb[10].mxu1  ;;  %v1398_v25 = vadd.f32 %v825_v21, %v623_v16  ;;  %v1378_v26 = vpop.f32.mrb[10].mxu0 }
 0x10f   : > { %v626_v27 = vpop.f32.mrb[11].mxu1  ;;  %883 = vst.msk [vmem:[%s1668_s8 + $0x50] sm:$0xff] %vm872_vm1, %v1397_v20  ;;  %v903_v29 = vadd.f32 %v902_v23, %v901_v18  ;;  %v1399_v30 = vadd.f32 %v1378_v26, %v1356_v22  ;;  %v828_v31 = vpop.f32.mrb[11].mxu0  ;;  %v956_v32 = vadd.f32 %v955_v28, %v954_v24  ;;  %v938_v42 = vmul.f32 %v1397_v20, %v1397_v20 }
 0x110   : > { %881 = vst.msk [vmem:[%s1668_s8 + $0x40] sm:$0xff] %vm872_vm1, %v1398_v25  ;;  %v904_v33 = vsel %vm872_vm1, %v1398_v25, 0.0  ;;  %v936_v34 = vmul.f32 %v1398_v25, %v1398_v25  ;;  %v1400_v35 = vadd.f32 %v828_v31, %v626_v27  ;;  %v908_v45 = vsel %vm872_vm1, %v1397_v20, 0.0 }
 0x111   : > { %v905_v37 = vadd.f32 %v904_v33, %v903_v29  ;;  %884 = vst.msk [vmem:[%s1668_s8 + $0x58] sm:$0xff] %vm872_vm1, %v1399_v30  ;;  %v958_v38 = vadd.f32 %v957_v36, %v956_v32  ;;  %v939_v50 = vmul.f32 %v1399_v30, %v1399_v30  ;;  %v910_v55 = vsel %vm872_vm1, %v1399_v30, 0.0 }
 0x112   : > { %v959_v39 = vsel %vm872_vm1, %v936_v34, 0.0  ;;  %882 = vst.msk [vmem:[%s1668_s8 + $0x48] sm:$0xff] %vm872_vm1, %v1400_v35  ;;  %v906_v40 = vsel %vm872_vm1, %v1400_v35, 0.0  ;;  %v937_v41 = vmul.f32 %v1400_v35, %v1400_v35  ;;  %v963_v60 = vsel %vm872_vm1, %v938_v42, 0.0 }
 0x113   : > { %v907_v43 = vadd.f32 %v906_v40, %v905_v37  ;;  %v960_v46 = vadd.f32 %v959_v39, %v958_v38  ;;  %v965_v4 = vsel %vm872_vm1, %v939_v50, 0.0 }
 0x114   : > { %v1359_v44 = vpop.f32.mrb[12].mxu1  ;;  %v961_v47 = vsel %vm872_vm1, %v937_v41, 0.0  ;;  %v1381_v48 = vpop.f32.mrb[12].mxu0 }
 0x115   : > { %v639_v49 = vpop.f32.mrb[13].mxu1  ;;  %v909_v51 = vadd.f32 %v908_v45, %v907_v43  ;;  %v1401_v52 = vadd.f32 %v1381_v48, %v1359_v44  ;;  %v841_v53 = vpop.f32.mrb[13].mxu0  ;;  %v962_v56 = vadd.f32 %v961_v47, %v960_v46 }
 0x116   : > { %v1360_v54 = vpop.f32.mrb[14].mxu1  ;;  %v1402_v57 = vadd.f32 %v841_v53, %v639_v49  ;;  %v1382_v58 = vpop.f32.mrb[14].mxu0 }
 0x117   : > { %v642_v59 = vpop.f32.mrb[15].mxu1  ;;  %887 = vst.msk [vmem:[%s1668_s8 + $0x70] sm:$0xff] %vm872_vm1, %v1401_v52  ;;  %v911_v61 = vadd.f32 %v910_v55, %v909_v51  ;;  %v1403_v62 = vadd.f32 %v1382_v58, %v1360_v54  ;;  %v844_v63 = vpop.f32.mrb[15].mxu0  ;;  %v964_v0 = vadd.f32 %v963_v60, %v962_v56  ;;  %v942_v10 = vmul.f32 %v1401_v52, %v1401_v52 }
 0x118   : > { %885 = vst.msk [vmem:[%s1668_s8 + $0x60] sm:$0xff] %vm872_vm1, %v1402_v57  ;;  %v912_v1 = vsel %vm872_vm1, %v1402_v57, 0.0  ;;  %v940_v2 = vmul.f32 %v1402_v57, %v1402_v57  ;;  %v1404_v3 = vadd.f32 %v844_v63, %v642_v59  ;;  %v916_v12 = vsel %vm872_vm1, %v1401_v52, 0.0 }
 0x119   : > { %v913_v5 = vadd.f32 %v912_v1, %v911_v61  ;;  %888 = vst.msk [vmem:[%s1668_s8 + $0x78] sm:$0xff] %vm872_vm1, %v1403_v62  ;;  %v966_v6 = vadd.f32 %v965_v4, %v964_v0  ;;  %v943_v15 = vmul.f32 %v1403_v62, %v1403_v62  ;;  %v918_v17 = vsel %vm872_vm1, %v1403_v62, 0.0 }
 0x11a   : > { %v967_v7 = vsel %vm872_vm1, %v940_v2, 0.0  ;;  %886 = vst.msk [vmem:[%s1668_s8 + $0x68] sm:$0xff] %vm872_vm1, %v1404_v3  ;;  %v914_v8 = vsel %vm872_vm1, %v1404_v3, 0.0  ;;  %v941_v9 = vmul.f32 %v1404_v3, %v1404_v3  ;;  %v971_v19 = vsel %vm872_vm1, %v942_v10, 0.0 }
 0x11b   : > { %v915_v11 = vadd.f32 %v914_v8, %v913_v5  ;;  %v968_v13 = vadd.f32 %v967_v7, %v966_v6  ;;  %v973_v22 = vsel %vm872_vm1, %v943_v15, 0.0 }
 0x11c   : > { %v969_v14 = vsel %vm872_vm1, %v941_v9, 0.0 }
 0x11d   : > { %v917_v16 = vadd.f32 %v916_v12, %v915_v11  ;;  %v970_v18 = vadd.f32 %v969_v14, %v968_v13 }
 0x11f   : > { %v919_v20 = vadd.f32 %v918_v17, %v917_v16  ;;  %v972_v21 = vadd.f32 %v971_v19, %v970_v18 }
 0x121   : > { %v920_v23 = vrot.slane %v919_v20, 4  ;;  %v974_v24 = vadd.f32 %v973_v22, %v972_v21 }
 0x123   : > { %v921_v25 = vadd.f32 %v920_v23, %v919_v20  ;;  %v975_v26 = vrot.slane %v974_v24, 4 }
 0x125   : > { %v922_v27 = vrot.slane %v921_v25, 2  ;;  %v976_v28 = vadd.f32 %v975_v26, %v974_v24 }
 0x127   : > { %v923_v29 = vadd.f32 %v922_v27, %v921_v25  ;;  %v977_v30 = vrot.slane %v976_v28, 2 }
 0x129   : > { %v924_v31 = vrot.slane %v923_v29, 1  ;;  %v978_v32 = vadd.f32 %v977_v30, %v976_v28 }
 0x12b   : > { %v925_v33 = vadd.f32 %v924_v31, %v923_v29  ;;  %v979_v34 = vrot.slane %v978_v32, 1 }
 0x12d   : > { %927 = vst.msk [vmem:[%s308_s13] sm:$0x1] %vm926_vm2, %v925_v33  ;;  %v980_v35 = vadd.f32 %v979_v34, %v978_v32 }
 0x12f   : > { %981 = vst.msk [vmem:[%s318_s23] sm:$0x1] %vm926_vm2, %v980_v35 }
 0x130 PF: > { %s15_s19 = sadd.s32 1, %s1527_s19   ;;  %s1762_s15 = smov %s1519_s17 }
 0x131   : > { %p12_p7 = scmp.ge.s32.totalorder %s15_s19, 6   ;;  %s1763_s16 = smov %s1523_s18 }
 0x132   : > { %s1764_s17 = smov %s1767_s20  ;;  %s1765_s18 = smov %s1771_s21 }
 0x133   :  { %14 = sbr.rel (!%p12_p7) target bundleno = 3 (0x3), region = 87 }

</bundles_post_ra>
